<compile_context>
chip_gen: v6e
topology: v6e:2x2x1
jax: 0.10.0
libtpu: 0.0.40
codegen_flags: <defaults>
</compile_context>

<pallas_src>
import functools
import math

import jax
import jax.numpy as jnp
from jax.experimental import pallas as pl
from jax.experimental.pallas import tpu as pltpu

# Make the plain-JAX reference matmuls match the in-kernel f32 MXU matmuls.
jax.config.update("jax_default_matmul_precision", "highest")

LN_EPS = 1e-5  # PyTorch nn.LayerNorm default


def _gelu_tanh(x):
    # TODO(synk): PyTorch nn.GELU default is exact (erf); tanh approximation is
    # used for robust Mosaic lowering (goes to the EUP).
    c = math.sqrt(2.0 / math.pi)
    return 0.5 * x * (1.0 + jnp.tanh(c * (x + 0.044715 * x * x * x)))


# ---------------------------------------------------------------------------
# Kernel 1: norm1 + MHSA + residual           (one batch element per grid step)
# ---------------------------------------------------------------------------
def _ln_mhsa_residual_kernel(x_ref, g_ref, b_ref, wq_ref, wk_ref, wv_ref,
                             bq_ref, bk_ref, bv_ref, o_ref, *, n_heads, d_head):
    x = x_ref[...].astype(jnp.float32)                          # (S, D)

    mean = jnp.mean(x, axis=-1, keepdims=True)
    var = jnp.mean(jnp.square(x - mean), axis=-1, keepdims=True)
    xn = (x - mean) * jax.lax.rsqrt(var + LN_EPS)
    xn = xn * g_ref[...] + b_ref[...]

    q = jnp.dot(xn, wq_ref[...], preferred_element_type=jnp.float32) + bq_ref[...]
    k = jnp.dot(xn, wk_ref[...], preferred_element_type=jnp.float32) + bk_ref[...]
    v = jnp.dot(xn, wv_ref[...], preferred_element_type=jnp.float32) + bv_ref[...]

    scale = 1.0 / math.sqrt(d_head)
    head_outs = []
    for h in range(n_heads):                                    # static unroll
        sl = slice(h * d_head, (h + 1) * d_head)
        qh, kh, vh = q[:, sl], k[:, sl], v[:, sl]
        # q @ k.T without materializing a transpose.
        s = jax.lax.dot_general(qh, kh, (((1,), (1,)), ((), ())),
                                preferred_element_type=jnp.float32) * scale
        s = s - jnp.max(s, axis=-1, keepdims=True)
        p = jnp.exp(s)
        p = p / jnp.sum(p, axis=-1, keepdims=True)
        # nn.Dropout(attention) is identity in eval mode.
        head_outs.append(jnp.dot(p, vh, preferred_element_type=jnp.float32))
    attn = jnp.concatenate(head_outs, axis=-1)                   # (S, D)

    o_ref[...] = (x + attn).astype(o_ref.dtype)


def ln_mhsa_residual(x, gamma, beta, wq, wk, wv, bq, bk, bv, *, n_heads):
    B, S, D = x.shape
    d_head = D // n_heads
    vec = lambda v: v.reshape(1, -1)
    kern = functools.partial(_ln_mhsa_residual_kernel, n_heads=n_heads, d_head=d_head)
    full2d = lambda shape: pl.BlockSpec(shape, lambda b: (0, 0))
    return pl.pallas_call(
        kern,
        out_shape=jax.ShapeDtypeStruct((B, S, D), x.dtype),
        grid_spec=pltpu.PrefetchScalarGridSpec(
            num_scalar_prefetch=0,
            grid=(B,),
            in_specs=[
                pl.BlockSpec((pl.Squeezed(), S, D), lambda b: (b, 0, 0)),  # x
                full2d((1, D)), full2d((1, D)),                            # ln1 g/b
                full2d((D, D)), full2d((D, D)), full2d((D, D)),            # Wq/Wk/Wv
                full2d((1, D)), full2d((1, D)), full2d((1, D)),            # bq/bk/bv
            ],
            out_specs=pl.BlockSpec((pl.Squeezed(), S, D), lambda b: (b, 0, 0)),
        ),
        compiler_params=pltpu.CompilerParams(dimension_semantics=("parallel",)),
    )(x, vec(gamma), vec(beta), wq, wk, wv, vec(bq), vec(bk), vec(bv))


# ---------------------------------------------------------------------------
# Kernel 2: norm2 + router projections        (one batch element per grid step)
# ---------------------------------------------------------------------------
def _ln_router_kernel(h_ref, g_ref, b_ref, wg_ref, bg_ref, wn_ref, bn_ref,
                      hn_ref, logit_ref, nlogit_ref):
    h = h_ref[...].astype(jnp.float32)                           # (S, D)
    mean = jnp.mean(h, axis=-1, keepdims=True)
    var = jnp.mean(jnp.square(h - mean), axis=-1, keepdims=True)
    hn = (h - mean) * jax.lax.rsqrt(var + LN_EPS)
    hn = hn * g_ref[...] + b_ref[...]

    hn_ref[...] = hn.astype(hn_ref.dtype)
    logit_ref[...] = (jnp.dot(hn, wg_ref[...], preferred_element_type=jnp.float32)
                      + bg_ref[...]).astype(logit_ref.dtype)
    nlogit_ref[...] = (jnp.dot(hn, wn_ref[...], preferred_element_type=jnp.float32)
                       + bn_ref[...]).astype(nlogit_ref.dtype)


def ln_router(h, gamma, beta, w_gate, b_gate, w_noise, b_noise):
    B, S, D = h.shape
    E = w_gate.shape[-1]
    vec = lambda v: v.reshape(1, -1)
    full2d = lambda shape: pl.BlockSpec(shape, lambda b: (0, 0))
    return pl.pallas_call(
        _ln_router_kernel,
        out_shape=(jax.ShapeDtypeStruct((B, S, D), h.dtype),
                   jax.ShapeDtypeStruct((B, S, E), jnp.float32),
                   jax.ShapeDtypeStruct((B, S, E), jnp.float32)),
        grid_spec=pltpu.PrefetchScalarGridSpec(
            num_scalar_prefetch=0,
            grid=(B,),
            in_specs=[
                pl.BlockSpec((pl.Squeezed(), S, D), lambda b: (b, 0, 0)),  # h
                full2d((1, D)), full2d((1, D)),                            # ln2 g/b
                full2d((D, E)), full2d((1, E)),                            # gate lin
                full2d((D, E)), full2d((1, E)),                            # noise lin
            ],
            out_specs=[
                pl.BlockSpec((pl.Squeezed(), S, D), lambda b: (b, 0, 0)),
                pl.BlockSpec((pl.Squeezed(), S, E), lambda b: (b, 0, 0)),
                pl.BlockSpec((pl.Squeezed(), S, E), lambda b: (b, 0, 0)),
            ],
        ),
        compiler_params=pltpu.CompilerParams(dimension_semantics=("parallel",)),
    )(h, vec(gamma), vec(beta), w_gate, vec(b_gate), w_noise, vec(b_noise))


# ---------------------------------------------------------------------------
# Kernel 3: experts + gated combine + residual (one expert per grid step,
#           tokens flattened to a lane-dense (N=B*S, D) slab, VMEM accumulator)
# ---------------------------------------------------------------------------
def _moe_experts_kernel(h_ref, hn_ref, w1_ref, b1_ref, w2_ref, b2_ref, gate_ref,
                        o_ref, acc_ref):
    e = pl.program_id(0)

    @pl.when(e == 0)
    def _():
        acc_ref[...] = h_ref[...].astype(jnp.float32)            # residual term

    hn = hn_ref[...].astype(jnp.float32)                         # (N, D)
    a = jnp.dot(hn, w1_ref[...], preferred_element_type=jnp.float32) + b1_ref[...]
    a = _gelu_tanh(a)
    # Expert nn.Dropout is identity in eval mode.
    eo = jnp.dot(a, w2_ref[...], preferred_element_type=jnp.float32) + b2_ref[...]
    acc_ref[...] += eo * gate_ref[...]                           # (N,1) gate bcast

    @pl.when(e == pl.num_programs(0) - 1)
    def _():
        o_ref[...] = acc_ref[...].astype(o_ref.dtype)


def moe_experts_combine(h_flat, hn_flat, w1, b1, w2, b2, gates_en1):
    N, D = h_flat.shape
    E, _, H = w1.shape
    return pl.pallas_call(
        _moe_experts_kernel,
        out_shape=jax.ShapeDtypeStruct((N, D), h_flat.dtype),
        grid_spec=pltpu.PrefetchScalarGridSpec(
            num_scalar_prefetch=0,
            grid=(E,),
            in_specs=[
                pl.BlockSpec((N, D), lambda e: (0, 0)),                      # residual
                pl.BlockSpec((N, D), lambda e: (0, 0)),                      # norm2(x)
                pl.BlockSpec((pl.Squeezed(), D, H), lambda e: (e, 0, 0)),    # W1[e]
                pl.BlockSpec((pl.Squeezed(), 1, H), lambda e: (e, 0, 0)),    # b1[e]
                pl.BlockSpec((pl.Squeezed(), H, D), lambda e: (e, 0, 0)),    # W2[e]
                pl.BlockSpec((pl.Squeezed(), 1, D), lambda e: (e, 0, 0)),    # b2[e]
                pl.BlockSpec((pl.Squeezed(), N, 1), lambda e: (e, 0, 0)),    # gate[e]
            ],
            out_specs=pl.BlockSpec((N, D), lambda e: (0, 0)),
            scratch_shapes=[pltpu.VMEM((N, D), jnp.float32)],
        ),
        compiler_params=pltpu.CompilerParams(dimension_semantics=("arbitrary",)),
    )(h_flat, hn_flat, w1, b1.reshape(E, 1, H), w2, b2.reshape(E, 1, D), gates_en1)


# ---------------------------------------------------------------------------
# Routing glue (NoisyTopkRouter post-processing + capacity limit) — XLA.
# ---------------------------------------------------------------------------
def noisy_topk_routing(logits, noise_logits, noise, top_k, expert_capacity):
    B, S, E = logits.shape
    N = B * S
    noisy = logits + noise * jax.nn.softplus(noise_logits)
    flat = noisy.reshape(N, E)
    _, top_idx = jax.lax.top_k(flat, top_k)                      # (N, k)
    sel = jnp.zeros((N, E), dtype=bool).at[
        jnp.arange(N)[:, None], top_idx].set(True)
    sparse = jnp.where(sel, flat, -jnp.inf)
    gates = jax.nn.softmax(sparse, axis=-1)                      # 0 off top-k
    # Capacity: keep the first `expert_capacity` selected tokens (flat order).
    rank = jnp.cumsum(sel.astype(jnp.int32), axis=0) - 1
    keep = sel & (rank < expert_capacity)
    return gates * keep.astype(gates.dtype)                      # (N, E)


# ---------------------------------------------------------------------------
# Full MyViTBlock forward.
# ---------------------------------------------------------------------------
def myvit_block_forward(x, params, noise, *, n_heads, top_k, capacity_factor=1.0):
    B, S, D = x.shape
    E = params["w_gate"].shape[-1]

    # out = x + MHSA(norm1(x))                       (Pallas kernel 1)
    h = ln_mhsa_residual(x, params["ln1_g"], params["ln1_b"],
                         params["wq"], params["wk"], params["wv"],
                         params["bq"], params["bk"], params["bv"],
                         n_heads=n_heads)

    # norm2 + router projections                     (Pallas kernel 2)
    hn, logits, noise_logits = ln_router(h, params["ln2_g"], params["ln2_b"],
                                         params["w_gate"], params["b_gate"],
                                         params["w_noise"], params["b_noise"])

    # Noisy top-k routing with expert capacity       (XLA glue)
    expert_capacity = int(B * S * top_k / E * capacity_factor)
    combine = noisy_topk_routing(logits, noise_logits, noise, top_k, expert_capacity)
    gates_en1 = combine.T[:, :, None]                            # (E, N, 1)

    # experts + weighted combine + residual          (Pallas kernel 3)
    out_flat = moe_experts_combine(h.reshape(B * S, D), hn.reshape(B * S, D),
                                   params["w1"], params["b1"],
                                   params["w2"], params["b2"], gates_en1)
    return out_flat.reshape(B, S, D)


# ---------------------------------------------------------------------------
# Parameter construction (random, deterministic) and plain-JAX reference.
# ---------------------------------------------------------------------------
def init_params(key, D, n_heads, num_experts, mlp_ratio=4):
    d_head = D // n_heads
    H = mlp_ratio * D
    ks = jax.random.split(key, 12)

    def block_diag_weight(k):
        per_head = jax.random.normal(k, (n_heads, d_head, d_head), jnp.float32)
        per_head = per_head / math.sqrt(d_head)
        w = jnp.zeros((D, D), jnp.float32)
        for h in range(n_heads):
            sl = slice(h * d_head, (h + 1) * d_head)
            w = w.at[sl, sl].set(per_head[h])
        return w

    return dict(
        ln1_g=jnp.ones((D,), jnp.float32), ln1_b=jnp.zeros((D,), jnp.float32),
        ln2_g=jnp.ones((D,), jnp.float32), ln2_b=jnp.zeros((D,), jnp.float32),
        wq=block_diag_weight(ks[0]), wk=block_diag_weight(ks[1]),
        wv=block_diag_weight(ks[2]),
        bq=0.02 * jax.random.normal(ks[3], (D,), jnp.float32),
        bk=0.02 * jax.random.normal(ks[4], (D,), jnp.float32),
        bv=0.02 * jax.random.normal(ks[5], (D,), jnp.float32),
        w_gate=jax.random.normal(ks[6], (D, num_experts), jnp.float32) / math.sqrt(D),
        b_gate=jnp.zeros((num_experts,), jnp.float32),
        w_noise=jax.random.normal(ks[7], (D, num_experts), jnp.float32) / math.sqrt(D),
        b_noise=jnp.zeros((num_experts,), jnp.float32),
        w1=jax.random.normal(ks[8], (num_experts, D, H), jnp.float32) / math.sqrt(D),
        b1=0.02 * jax.random.normal(ks[9], (num_experts, H), jnp.float32),
        w2=jax.random.normal(ks[10], (num_experts, H, D), jnp.float32) / math.sqrt(H),
        b2=0.02 * jax.random.normal(ks[11], (num_experts, D), jnp.float32),
    )


def reference_forward(x, params, noise, *, n_heads, top_k, capacity_factor=1.0):
    B, S, D = x.shape
    d_head = D // n_heads
    E = params["w_gate"].shape[-1]

    def ln(v, g, b):
        m = v.mean(-1, keepdims=True)
        var = ((v - m) ** 2).mean(-1, keepdims=True)
        return (v - m) / jnp.sqrt(var + LN_EPS) * g + b

    xn = ln(x, params["ln1_g"], params["ln1_b"])
    q = xn @ params["wq"] + params["bq"]
    k = xn @ params["wk"] + params["bk"]
    v = xn @ params["wv"] + params["bv"]
    heads = []
    for h in range(n_heads):
        sl = slice(h * d_head, (h + 1) * d_head)
        s = jnp.einsum("bqd,bkd->bqk", q[..., sl], k[..., sl]) / math.sqrt(d_head)
        p = jax.nn.softmax(s, axis=-1)
        heads.append(jnp.einsum("bqk,bkd->bqd", p, v[..., sl]))
    h_res = x + jnp.concatenate(heads, axis=-1)

    hn = ln(h_res, params["ln2_g"], params["ln2_b"])
    logits = hn @ params["w_gate"] + params["b_gate"]
    nlogits = hn @ params["w_noise"] + params["b_noise"]
    expert_capacity = int(B * S * top_k / E * capacity_factor)
    combine = noisy_topk_routing(logits, nlogits, noise, top_k, expert_capacity)

    hn_flat = hn.reshape(-1, D)
    upd = jnp.zeros_like(hn_flat)
    for e in range(E):
        a = _gelu_tanh(hn_flat @ params["w1"][e] + params["b1"][e])
        eo = a @ params["w2"][e] + params["b2"][e]
        upd = upd + eo * combine[:, e:e + 1]
    return h_res + upd.reshape(B, S, D)


if __name__ == "__main__":
    B, S, D = 2, 8, 32          # small shapes consistent with the module
    n_heads, num_experts, top_k = 2, 8, 2

    key = jax.random.PRNGKey(0)
    kx, knoise, kp = jax.random.split(key, 3)
    x = jax.random.normal(kx, (B, S, D), dtype=jnp.float32)
    # Router noise (torch.randn_like) generated deterministically on the host.
    noise = jax.random.normal(knoise, (B, S, num_experts), dtype=jnp.float32)
    params = init_params(kp, D, n_heads, num_experts)

    out = myvit_block_forward(x, params, noise, n_heads=n_heads, top_k=top_k)
    out = jax.block_until_ready(out)

    assert out.shape == (B, S, D)
    assert bool(jnp.all(jnp.isfinite(out)))

    ref = reference_forward(x, params, noise, n_heads=n_heads, top_k=top_k)
    assert jnp.allclose(out, ref, atol=5e-3, rtol=5e-3), \
        f"mismatch vs reference, max abs err {jnp.max(jnp.abs(out - ref))}"

    print("KERNEL_OK")
</pallas_src>

<mosaic_0001>
module attributes {stable_mosaic.version = 11 : i64} {
  func.func @_ln_mhsa_residual_kernel(%arg0: i32, %arg1: memref<1x8x32xf32, #tpu.memory_space<vmem>>, %arg2: memref<1x32xf32, #tpu.memory_space<vmem>>, %arg3: memref<1x32xf32, #tpu.memory_space<vmem>>, %arg4: memref<32x32xf32, #tpu.memory_space<vmem>>, %arg5: memref<32x32xf32, #tpu.memory_space<vmem>>, %arg6: memref<32x32xf32, #tpu.memory_space<vmem>>, %arg7: memref<1x32xf32, #tpu.memory_space<vmem>>, %arg8: memref<1x32xf32, #tpu.memory_space<vmem>>, %arg9: memref<1x32xf32, #tpu.memory_space<vmem>>, %arg10: memref<1x8x32xf32, #tpu.memory_space<vmem>>) attributes {dimension_semantics = [#tpu.dimension_semantics<parallel>], iteration_bounds = array<i64: 2>, scalar_prefetch = 0 : i64, scratch_operands = 0 : i64, tpu.core_type = #tpu.core_type<tc>, window_params = [{transform_indices = @transform_0, window_bounds = array<i64: 1, 8, 32>}, {pipeline_mode = #tpu.pipeline_mode<synchronous>, transform_indices = @transform_1, window_bounds = array<i64: 1, 32>}, {pipeline_mode = #tpu.pipeline_mode<synchronous>, transform_indices = @transform_2, window_bounds = array<i64: 1, 32>}, {pipeline_mode = #tpu.pipeline_mode<synchronous>, transform_indices = @transform_3, window_bounds = array<i64: 32, 32>}, {pipeline_mode = #tpu.pipeline_mode<synchronous>, transform_indices = @transform_4, window_bounds = array<i64: 32, 32>}, {pipeline_mode = #tpu.pipeline_mode<synchronous>, transform_indices = @transform_5, window_bounds = array<i64: 32, 32>}, {pipeline_mode = #tpu.pipeline_mode<synchronous>, transform_indices = @transform_6, window_bounds = array<i64: 1, 32>}, {pipeline_mode = #tpu.pipeline_mode<synchronous>, transform_indices = @transform_7, window_bounds = array<i64: 1, 32>}, {pipeline_mode = #tpu.pipeline_mode<synchronous>, transform_indices = @transform_8, window_bounds = array<i64: 1, 32>}, {transform_indices = @transform_9, window_bounds = array<i64: 1, 8, 32>}]} {
    %c0 = arith.constant 0 : index
    %c0_0 = arith.constant 0 : index
    %c0_1 = arith.constant 0 : index
    %0 = vector.load %arg1[%c0, %c0_0, %c0_1] : memref<1x8x32xf32, #tpu.memory_space<vmem>>, vector<1x8x32xf32>
    %1 = vector.shape_cast %0 : vector<1x8x32xf32> to vector<8x32xf32>
    %cst = arith.constant dense<0.000000e+00> : vector<8xf32>
    %2 = vector.multi_reduction <add>, %1, %cst [1] : vector<8x32xf32> to vector<8xf32>
    %3 = vector.shape_cast %2 : vector<8xf32> to vector<8x1xf32>
    %cst_2 = arith.constant 3.200000e+01 : f32
    %4 = vector.broadcast %cst_2 : f32 to vector<8x1xf32>
    %5 = arith.divf %3, %4 : vector<8x1xf32>
    %6 = vector.broadcast %5 : vector<8x1xf32> to vector<8x32xf32>
    %7 = arith.subf %1, %6 : vector<8x32xf32>
    %8 = arith.mulf %7, %7 : vector<8x32xf32>
    %cst_3 = arith.constant dense<0.000000e+00> : vector<8xf32>
    %9 = vector.multi_reduction <add>, %8, %cst_3 [1] : vector<8x32xf32> to vector<8xf32>
    %10 = vector.shape_cast %9 : vector<8xf32> to vector<8x1xf32>
    %cst_4 = arith.constant 3.200000e+01 : f32
    %11 = vector.broadcast %cst_4 : f32 to vector<8x1xf32>
    %12 = arith.divf %10, %11 : vector<8x1xf32>
    %13 = vector.broadcast %5 : vector<8x1xf32> to vector<8x32xf32>
    %14 = arith.subf %1, %13 : vector<8x32xf32>
    %cst_5 = arith.constant 9.99999974E-6 : f32
    %15 = vector.broadcast %cst_5 : f32 to vector<8x1xf32>
    %16 = arith.addf %12, %15 : vector<8x1xf32>
    %17 = math.rsqrt %16 : vector<8x1xf32>
    %18 = vector.broadcast %17 : vector<8x1xf32> to vector<8x32xf32>
    %19 = arith.mulf %14, %18 : vector<8x32xf32>
    %c0_6 = arith.constant 0 : index
    %c0_7 = arith.constant 0 : index
    %20 = vector.load %arg2[%c0_6, %c0_7] : memref<1x32xf32, #tpu.memory_space<vmem>>, vector<1x32xf32>
    %21 = vector.broadcast %20 : vector<1x32xf32> to vector<8x32xf32>
    %22 = arith.mulf %19, %21 : vector<8x32xf32>
    %c0_8 = arith.constant 0 : index
    %c0_9 = arith.constant 0 : index
    %23 = vector.load %arg3[%c0_8, %c0_9] : memref<1x32xf32, #tpu.memory_space<vmem>>, vector<1x32xf32>
    %24 = vector.broadcast %23 : vector<1x32xf32> to vector<8x32xf32>
    %25 = arith.addf %22, %24 : vector<8x32xf32>
    %c0_10 = arith.constant 0 : index
    %c0_11 = arith.constant 0 : index
    %26 = vector.load %arg4[%c0_10, %c0_11] : memref<32x32xf32, #tpu.memory_space<vmem>>, vector<32x32xf32>
    %cst_12 = arith.constant dense<0.000000e+00> : vector<8x32xf32>
    %27 = tpu.matmul %25, %26, %cst_12 {dimension_numbers = #tpu.dot_dimension_numbers<[1], [0], [0], [1], [0, 0, 1, 1], [], []>, precision = #tpu.contract_precision<fp32>} : vector<8x32xf32>, vector<32x32xf32>, vector<8x32xf32> -> vector<8x32xf32>
    %c0_13 = arith.constant 0 : index
    %c0_14 = arith.constant 0 : index
    %28 = vector.load %arg7[%c0_13, %c0_14] : memref<1x32xf32, #tpu.memory_space<vmem>>, vector<1x32xf32>
    %29 = vector.broadcast %28 : vector<1x32xf32> to vector<8x32xf32>
    %30 = arith.addf %27, %29 : vector<8x32xf32>
    %c0_15 = arith.constant 0 : index
    %c0_16 = arith.constant 0 : index
    %31 = vector.load %arg5[%c0_15, %c0_16] : memref<32x32xf32, #tpu.memory_space<vmem>>, vector<32x32xf32>
    %cst_17 = arith.constant dense<0.000000e+00> : vector<8x32xf32>
    %32 = tpu.matmul %25, %31, %cst_17 {dimension_numbers = #tpu.dot_dimension_numbers<[1], [0], [0], [1], [0, 0, 1, 1], [], []>, precision = #tpu.contract_precision<fp32>} : vector<8x32xf32>, vector<32x32xf32>, vector<8x32xf32> -> vector<8x32xf32>
    %c0_18 = arith.constant 0 : index
    %c0_19 = arith.constant 0 : index
    %33 = vector.load %arg8[%c0_18, %c0_19] : memref<1x32xf32, #tpu.memory_space<vmem>>, vector<1x32xf32>
    %34 = vector.broadcast %33 : vector<1x32xf32> to vector<8x32xf32>
    %35 = arith.addf %32, %34 : vector<8x32xf32>
    %c0_20 = arith.constant 0 : index
    %c0_21 = arith.constant 0 : index
    %36 = vector.load %arg6[%c0_20, %c0_21] : memref<32x32xf32, #tpu.memory_space<vmem>>, vector<32x32xf32>
    %cst_22 = arith.constant dense<0.000000e+00> : vector<8x32xf32>
    %37 = tpu.matmul %25, %36, %cst_22 {dimension_numbers = #tpu.dot_dimension_numbers<[1], [0], [0], [1], [0, 0, 1, 1], [], []>, precision = #tpu.contract_precision<fp32>} : vector<8x32xf32>, vector<32x32xf32>, vector<8x32xf32> -> vector<8x32xf32>
    %c0_23 = arith.constant 0 : index
    %c0_24 = arith.constant 0 : index
    %38 = vector.load %arg9[%c0_23, %c0_24] : memref<1x32xf32, #tpu.memory_space<vmem>>, vector<1x32xf32>
    %39 = vector.broadcast %38 : vector<1x32xf32> to vector<8x32xf32>
    %40 = arith.addf %37, %39 : vector<8x32xf32>
    %41 = vector.extract_strided_slice %30 {offsets = [0, 0], sizes = [8, 16], strides = [1, 1]} : vector<8x32xf32> to vector<8x16xf32>
    %42 = vector.extract_strided_slice %35 {offsets = [0, 0], sizes = [8, 16], strides = [1, 1]} : vector<8x32xf32> to vector<8x16xf32>
    %43 = vector.extract_strided_slice %40 {offsets = [0, 0], sizes = [8, 16], strides = [1, 1]} : vector<8x32xf32> to vector<8x16xf32>
    %cst_25 = arith.constant dense<0.000000e+00> : vector<8x8xf32>
    %44 = tpu.matmul %41, %42, %cst_25 {dimension_numbers = #tpu.dot_dimension_numbers<[1], [1], [0], [0], [0, 0, 1, 0], [], []>, precision = #tpu.contract_precision<fp32>} : vector<8x16xf32>, vector<8x16xf32>, vector<8x8xf32> -> vector<8x8xf32>
    %cst_26 = arith.constant 2.500000e-01 : f32
    %45 = vector.broadcast %cst_26 : f32 to vector<8x8xf32>
    %46 = arith.mulf %44, %45 : vector<8x8xf32>
    %cst_27 = arith.constant dense<0xFF800000> : vector<8xf32>
    %47 = vector.multi_reduction <maximumf>, %46, %cst_27 [1] : vector<8x8xf32> to vector<8xf32>
    %48 = vector.shape_cast %47 : vector<8xf32> to vector<8x1xf32>
    %49 = vector.broadcast %48 : vector<8x1xf32> to vector<8x8xf32>
    %50 = arith.subf %46, %49 : vector<8x8xf32>
    %51 = math.exp %50 : vector<8x8xf32>
    %cst_28 = arith.constant dense<0.000000e+00> : vector<8xf32>
    %52 = vector.multi_reduction <add>, %51, %cst_28 [1] : vector<8x8xf32> to vector<8xf32>
    %53 = vector.shape_cast %52 : vector<8xf32> to vector<8x1xf32>
    %54 = vector.broadcast %53 : vector<8x1xf32> to vector<8x8xf32>
    %55 = arith.divf %51, %54 : vector<8x8xf32>
    %cst_29 = arith.constant dense<0.000000e+00> : vector<8x16xf32>
    %56 = tpu.matmul %55, %43, %cst_29 {dimension_numbers = #tpu.dot_dimension_numbers<[1], [0], [0], [1], [0, 0, 1, 1], [], []>, precision = #tpu.contract_precision<fp32>} : vector<8x8xf32>, vector<8x16xf32>, vector<8x16xf32> -> vector<8x16xf32>
    %57 = vector.extract_strided_slice %30 {offsets = [0, 16], sizes = [8, 16], strides = [1, 1]} : vector<8x32xf32> to vector<8x16xf32>
    %58 = vector.extract_strided_slice %35 {offsets = [0, 16], sizes = [8, 16], strides = [1, 1]} : vector<8x32xf32> to vector<8x16xf32>
    %59 = vector.extract_strided_slice %40 {offsets = [0, 16], sizes = [8, 16], strides = [1, 1]} : vector<8x32xf32> to vector<8x16xf32>
    %cst_30 = arith.constant dense<0.000000e+00> : vector<8x8xf32>
    %60 = tpu.matmul %57, %58, %cst_30 {dimension_numbers = #tpu.dot_dimension_numbers<[1], [1], [0], [0], [0, 0, 1, 0], [], []>, precision = #tpu.contract_precision<fp32>} : vector<8x16xf32>, vector<8x16xf32>, vector<8x8xf32> -> vector<8x8xf32>
    %cst_31 = arith.constant 2.500000e-01 : f32
    %61 = vector.broadcast %cst_31 : f32 to vector<8x8xf32>
    %62 = arith.mulf %60, %61 : vector<8x8xf32>
    %cst_32 = arith.constant dense<0xFF800000> : vector<8xf32>
    %63 = vector.multi_reduction <maximumf>, %62, %cst_32 [1] : vector<8x8xf32> to vector<8xf32>
    %64 = vector.shape_cast %63 : vector<8xf32> to vector<8x1xf32>
    %65 = vector.broadcast %64 : vector<8x1xf32> to vector<8x8xf32>
    %66 = arith.subf %62, %65 : vector<8x8xf32>
    %67 = math.exp %66 : vector<8x8xf32>
    %cst_33 = arith.constant dense<0.000000e+00> : vector<8xf32>
    %68 = vector.multi_reduction <add>, %67, %cst_33 [1] : vector<8x8xf32> to vector<8xf32>
    %69 = vector.shape_cast %68 : vector<8xf32> to vector<8x1xf32>
    %70 = vector.broadcast %69 : vector<8x1xf32> to vector<8x8xf32>
    %71 = arith.divf %67, %70 : vector<8x8xf32>
    %cst_34 = arith.constant dense<0.000000e+00> : vector<8x16xf32>
    %72 = tpu.matmul %71, %59, %cst_34 {dimension_numbers = #tpu.dot_dimension_numbers<[1], [0], [0], [1], [0, 0, 1, 1], [], []>, precision = #tpu.contract_precision<fp32>} : vector<8x8xf32>, vector<8x16xf32>, vector<8x16xf32> -> vector<8x16xf32>
    %73 = tpu.concatenate %56, %72 in 1 : vector<8x16xf32>, vector<8x16xf32> -> vector<8x32xf32>
    %74 = arith.addf %1, %73 : vector<8x32xf32>
    %c0_35 = arith.constant 0 : index
    %c0_36 = arith.constant 0 : index
    %c0_37 = arith.constant 0 : index
    %75 = vector.load %arg10[%c0_35, %c0_36, %c0_37] : memref<1x8x32xf32, #tpu.memory_space<vmem>>, vector<1x8x32xf32>
    %76 = vector.shape_cast %75 : vector<1x8x32xf32> to vector<8x32xf32>
    %77 = vector.shape_cast %74 : vector<8x32xf32> to vector<1x8x32xf32>
    tpu.vector_store %arg10[%c0_35, %c0_36, %c0_37], %77 {strides = array<i32>} : memref<1x8x32xf32, #tpu.memory_space<vmem>>, vector<1x8x32xf32>,
    return
  }
  func.func @transform_0(%arg0: i32) -> (i32, i32, i32) {
    %c0_i32 = arith.constant 0 : i32
    %c0_i32_0 = arith.constant 0 : i32
    %c0_i32_1 = arith.constant 0 : i32
    return %arg0, %c0_i32, %c0_i32_0 : i32, i32, i32
  }
  func.func @transform_1(%arg0: i32) -> (i32, i32) {
    %c0_i32 = arith.constant 0 : i32
    %c0_i32_0 = arith.constant 0 : i32
    %c0_i32_1 = arith.constant 0 : i32
    return %c0_i32, %c0_i32_0 : i32, i32
  }
  func.func @transform_2(%arg0: i32) -> (i32, i32) {
    %c0_i32 = arith.constant 0 : i32
    %c0_i32_0 = arith.constant 0 : i32
    %c0_i32_1 = arith.constant 0 : i32
    return %c0_i32, %c0_i32_0 : i32, i32
  }
  func.func @transform_3(%arg0: i32) -> (i32, i32) {
    %c0_i32 = arith.constant 0 : i32
    %c0_i32_0 = arith.constant 0 : i32
    %c0_i32_1 = arith.constant 0 : i32
    return %c0_i32, %c0_i32_0 : i32, i32
  }
  func.func @transform_4(%arg0: i32) -> (i32, i32) {
    %c0_i32 = arith.constant 0 : i32
    %c0_i32_0 = arith.constant 0 : i32
    %c0_i32_1 = arith.constant 0 : i32
    return %c0_i32, %c0_i32_0 : i32, i32
  }
  func.func @transform_5(%arg0: i32) -> (i32, i32) {
    %c0_i32 = arith.constant 0 : i32
    %c0_i32_0 = arith.constant 0 : i32
    %c0_i32_1 = arith.constant 0 : i32
    return %c0_i32, %c0_i32_0 : i32, i32
  }
  func.func @transform_6(%arg0: i32) -> (i32, i32) {
    %c0_i32 = arith.constant 0 : i32
    %c0_i32_0 = arith.constant 0 : i32
    %c0_i32_1 = arith.constant 0 : i32
    return %c0_i32, %c0_i32_0 : i32, i32
  }
  func.func @transform_7(%arg0: i32) -> (i32, i32) {
    %c0_i32 = arith.constant 0 : i32
    %c0_i32_0 = arith.constant 0 : i32
    %c0_i32_1 = arith.constant 0 : i32
    return %c0_i32, %c0_i32_0 : i32, i32
  }
  func.func @transform_8(%arg0: i32) -> (i32, i32) {
    %c0_i32 = arith.constant 0 : i32
    %c0_i32_0 = arith.constant 0 : i32
    %c0_i32_1 = arith.constant 0 : i32
    return %c0_i32, %c0_i32_0 : i32, i32
  }
  func.func @transform_9(%arg0: i32) -> (i32, i32, i32) {
    %c0_i32 = arith.constant 0 : i32
    %c0_i32_0 = arith.constant 0 : i32
    %c0_i32_1 = arith.constant 0 : i32
    return %arg0, %c0_i32, %c0_i32_0 : i32, i32, i32
  }
}

</mosaic_0001>

<bundles_post_ra>
// kernel: tpu_custom_call.1
= control target key start
LH: loop header
LB: loop body
LE: loop exit
PB: predicated region body
PF: predicated region fallthrough
CT: control target
= control target key end

     0   :  { %s5312_s0 = inlined_call_operand.hbm [shape: f32[2,8,32], index: 0, kind: input, shape index: {}]   ;;  %s5313_s1 = inlined_call_operand.vmem [shape: f32[1,32], index: 1, kind: input, shape index: {}]   ;;  %s5314_s2 = inlined_call_operand.vmem [shape: f32[1,32], index: 2, kind: input, shape index: {}]   ;;  %s5315_s3 = inlined_call_operand.hbm [shape: f32[32,32], index: 3, kind: input, shape index: {}]   ;;  %s5316_s4 = inlined_call_operand.hbm [shape: f32[32,32], index: 4, kind: input, shape index: {}]   ;;  %s5317_s5 = inlined_call_operand.hbm [shape: f32[32,32], index: 5, kind: input, shape index: {}]   ;;  %s5318_s6 = inlined_call_operand.vmem [shape: f32[1,32], index: 6, kind: input, shape index: {}]   ;;  %s5319_s7 = inlined_call_operand.vmem [shape: f32[1,32], index: 7, kind: input, shape index: {}]   ;;  %s5320_s8 = inlined_call_operand.vmem [shape: f32[1,32], index: 8, kind: input, shape index: {}]   ;;  %s5321_s9 = inlined_call_operand.hbm [shape: f32[2,8,32], index: 9, kind: output, shape index: {}]  }
   0x1   :  { %5326 = sst [smem:[#allocation16_spill]] %s5315_s3 }
   0x2   :  { %5327 = sst [smem:[#allocation17_spill]] %s5316_s4 }
   0x3   :  { %5328 = sst [smem:[#allocation18_spill]] %s5317_s5 }
   0x4   :  { %14 = vsyncpa [#allocation3], 0 }
   0x5   :  { %16 = vsyncpa [#allocation3 + $0x1], 0 }
   0x6   :  { %17 = vsyncpa [#allocation6], 0 }
   0x7   :  { %18 = vsyncpa [#allocation9], 0 }
   0x8   :  { %19 = vsyncpa [#allocation4], 0 }
   0x9   :  { %21 = vsyncpa [#allocation4 + $0x1], 0  ;;  %s4683_s30 = smov 0   ;;  %s4685_s10 = smov 0  }
   0xa   :  { %s4687_s11 = smov 0   ;;  %s4689_s12 = smov 0  }
   0xb LB: > { %s4704_s13 = sadd.s32 4294967295, %s4620_s12   ;;  %s3869_s14 = sadd.s32 4294967294, %s4620_s12   ;;  %s4620_s12 = sphi %s4689_s12, %s5353_s12   ;;  %s4616_s11 = sphi %s4687_s11, %s5352_s11   ;;  %s4612_s10 = sphi %s4685_s10, %s5351_s10   ;;  %s4608_s30 = sphi %s4683_s30, %s5350_s30  }
   0xc   : > { %p47_p0 = scmp.ne.s32.totalorder %s4612_s10, %s4608_s30  ;;  %p5322_p1 = scmp.eq.s32.totalorder %s4704_s13, 0 }
   0xd   : > { %p245_p3 = scmp.eq.s32.totalorder %s3869_s14, 1  ;;  %p3870_p5 = scmp.ge.s32.totalorder %s4620_s12, 1 }
   0xe   : > { %p4713_p4 = por %p5322_p1, %p47_p0  ;;  %p252_p7 = scmp.lt.s32.totalorder %s4620_s12, 3 }
   0xf   : > { %p4718_p6 = por %p245_p3, %p47_p0  ;;  %s4622_s18 = smov [#allocation5]  }
  0x10   : > { %s5329_s15 = scalar_select %p4713_p4, 1, 0 }
  0x11   : > { %s5330_s16 = scalar_select %p4718_p6, 1, 0 }
  0x12   : > { %p4723_p8 = pnand %p3870_p5, %p252_p7  ;;  %s270_s19 = sshll.u32 %s4622_s18, 4  ;;  %s271_s19 = int_to_ptr.vmem [resolvable:$true] %s270_s19 }
  0x13   : > { %s4623_s21 = smov [#allocation7]   ;;  %s4624_s23 = smov [#allocation8]  }
  0x14   : > { %s5331_s17 = scalar_select %p4723_p8, 1, 0 }
  0x15   : > { %p4364_p9 = pneg %p4723_p8  ;;  %s283_s22 = sshll.u32 %s4623_s21, 4  ;;  %s284_s22 = int_to_ptr.vmem [resolvable:$true] %s283_s22 }
  0x16   : > { %s296_s24 = sshll.u32 %s4624_s23, 4  ;;  %s4453_s25 = scalar_lea.vmem %s271_s19, 512  ;;  %s297_s24 = int_to_ptr.vmem [resolvable:$true] %s296_s24 }
  0x17   : > { %p4732_p11 = pnand %p4364_p9, %p5322_p1  ;;  %p4454_p13 = scmp.ne.s32.totalorder %s271_s19, %s4453_s25 }
  0x18   : > { %p4461_p5 = scmp.lt.s32.totalorder %s271_s19, %s271_s19  ;;  %p4462_p7 = scmp.lt.s32.totalorder %s4453_s25, %s4453_s25 }
  0x19   : > { %p4444_p12 = pneg %p4732_p11 }
  0x1a   : > { %p4463_p9 = por %p4462_p7, %p4461_p5 }
  0x1b   : > { %p4456_p0 = pnand %p4454_p13, %p4444_p12 }
  0x1d   : > { %p4457_p3 = pneg %p4456_p0 }
  0x1f   : > { %p4464_p10 = pnand %p4463_p9, %p4457_p3 }
  0x21   : > { %4467 = shalt.err (!%p4464_p10)
}
  0x22   : > { %s4625_s26 = smov 128   ;;  %s4626_s27 = smov 8  }
  0x23   : > { %s5333_s3 = sld [smem:[#allocation16_spill]]  ;;  %s4479_s14 = scalar_lea.vmem %s284_s22, 512 }
  0x24   : > { %p4480_p1 = scmp.ne.s32.totalorder %s284_s22, %s4479_s14  ;;  %p4487_p2 = scmp.lt.s32.totalorder %s284_s22, %s284_s22 }
  0x25   : > { %p4488_p6 = scmp.lt.s32.totalorder %s4479_s14, %s4479_s14 }
  0x26   : > { %p4482_p13 = pnand %p4480_p1, %p4444_p12 }
  0x27   : > { %p4489_p5 = por %p4488_p6, %p4487_p2 }
  0x28   : > { %p4483_p0 = pneg %p4482_p13 }
  0x29   : > { %4367 = dma.hbm_to_vmem [thread:$0]  (!%p4732_p11), %s5333_s3, 512, %s271_s19, [#allocation6], %s4625_s26, %s4625_s26, %s4626_s27  }
  0x2a   : > { %p4490_p3 = pnand %p4489_p5, %p4483_p0 }
  0x2c   : > { %4493 = shalt.err (!%p4490_p3)
}
  0x2d   : > { %s5334_s4 = sld [smem:[#allocation17_spill]]  ;;  %s4505_s19 = scalar_lea.vmem %s297_s24, 512 }
  0x2e   : > { %p4506_p10 = scmp.ne.s32.totalorder %s297_s24, %s4505_s19  ;;  %p4513_p9 = scmp.lt.s32.totalorder %s297_s24, %s297_s24 }
  0x2f   : > { %p4514_p13 = scmp.lt.s32.totalorder %s4505_s19, %s4505_s19 }
  0x30   : > { %p4508_p7 = pnand %p4506_p10, %p4444_p12 }
  0x31   : > { %p4515_p4 = por %p4514_p13, %p4513_p9 }
  0x32   : > { %p4509_p1 = pneg %p4508_p7 }
  0x33   : > { %4370 = dma.hbm_to_vmem [thread:$0]  (!%p4732_p11), %s5334_s4, 512, %s284_s22, [#allocation6], %s4625_s26, %s4625_s26, %s4626_s27  }
  0x34   : > { %p4516_p2 = pnand %p4515_p4, %p4509_p1 }
  0x36   : > { %4519 = shalt.err (!%p4516_p2)
}
  0x37   : > { %s5335_s5 = sld [smem:[#allocation18_spill]]  ;;  %s4763_s22 = sadd.s32 1, %s4620_s12  }
  0x38   : > { %s31_s28 = ssub.s32 %s4620_s12, %s4763_s22  ;;  %s34_s20 = sadd.s32 1, %s4616_s11 }
  0x39   : > { %p32_p4 = scmp.eq.s32.totalorder %s31_s28, 0  ;;  %p41_p6 = scmp.ne.s32.totalorder %s4616_s11, %s4612_s10 }
  0x3a   : > { %p42_p12 = scmp.eq.s32.totalorder %s4620_s12, 0  ;;  %p4385_p0 = scmp.lt.s32.totalorder %s4620_s12, 2 }
  0x3b   : > { %s4773_s29 = scalar_select %p32_p4, %s4616_s11, %s34_s20  }
  0x3c   : > { %p43_p5 = por %p42_p12, %p41_p6  ;;  %p5337_p3 = scmp.eq.s32.totalorder %s4704_s13, 1 }
  0x3d   : > { %4373 = dma.hbm_to_vmem [thread:$0]  (!%p4732_p11), %s5335_s5, 512, %s297_s24, [#allocation9], %s4625_s26, %s4625_s26, %s4626_s27  }
  0x3e   : > { %5336 = sst [smem:[#allocation15_spill]] %s4773_s29  ;;  %p4777_p10 = por %p5337_p3, %p41_p6 }
  0x3f   : > { %s319_s18 = sand.u32 1, %s4616_s11   ;;  %s3876_s21 = sshll.u32 %s4620_s12, 7 }
  0x40   : > { %s5338_s14 = scalar_select %p4777_p10, 1, 0 }
  0x41   : > { %s3875_s24 = sshll.u32 %s319_s18, 3  ;;  %s4786_s19 = scalar_lea.hbm %s5312_s0, %s3876_s21 }
  0x42   : > { %s323_s23 = scalar_lea.vmem [#allocation2], %s3875_s24  ;;  %p4788_p11 = pnand %p4385_p0, %p43_p5 }
  0x43   : > { %s330_s25 = sshll.u32 %s323_s23, 4  ;;  %s320_s20 = scalar_lea.sflag [#allocation3], %s319_s18  ;;  %s331_s25 = int_to_ptr.vmem [resolvable:$true] %s330_s25 }
  0x44   : > { %s4520_s3 = scalar_lea.hbm %s4786_s19, 128  ;;  %p4522_p1 = pneg %p4788_p11 }
  0x45   : > { %p4521_p7 = scmp.ne.s32.totalorder %s4786_s19, %s4520_s3  ;;  %s4525_s27 = scalar_lea.hbm %s5312_s0, 256 }
  0x46   : > { %p4526_p2 = scmp.lt.s32.totalorder %s4786_s19, %s5312_s0  ;;  %p4527_p4 = scmp.lt.s32.totalorder %s4525_s27, %s4520_s3 }
  0x47   : > { %p4523_p9 = pnand %p4522_p1, %p4521_p7 }
  0x48   : > { %p4528_p6 = por %p4527_p4, %p4526_p2 }
  0x49   : > { %p4524_p13 = pneg %p4523_p9 }
  0x4b   : > { %p4529_p12 = pnand %p4528_p6, %p4524_p13 }
  0x4d   : > { %4532 = shalt.err (!%p4529_p12)
}
  0x4e   : > { %s4533_s23 = scalar_lea.vmem %s331_s25, 128  ;;  %s4627_s18 = smov [#allocation2]  }
  0x4f   : > { %p4534_p0 = scmp.ne.s32.totalorder %s331_s25, %s4533_s23  ;;  %s4538_s5 = sshll.u32 %s4627_s18, 4  ;;  %s4539_s5 = int_to_ptr.vmem [resolvable:$false] %s4538_s5 }
  0x50   : > { %s4540_s29 = scalar_lea.vmem %s4539_s5, 256  ;;  %p4541_p7 = scmp.lt.s32.totalorder %s331_s25, %s4539_s5 }
  0x51   : > { %p4536_p5 = pnand %p4534_p0, %p4522_p1  ;;  %p4542_p9 = scmp.lt.s32.totalorder %s4540_s29, %s4533_s23 }
  0x53   : > { %p4537_p3 = pneg %p4536_p5  ;;  %p4543_p10 = por %p4542_p9, %p4541_p7 }
  0x55   : > { %p4544_p8 = pnand %p4543_p10, %p4537_p3 }
  0x57   : > { %4547 = shalt.err (!%p4544_p8)
}
  0x58   : > { %4377 = dma.hbm_to_vmem [thread:$0]  (!%p4788_p11), %s4786_s19, 128, %s331_s25, %s320_s20  }
  0x59   : > { %p5340_p13 = scmp.ne.s32.totalorder %s5331_s17, 0 }
  0x5a   : > { %s4809_s3 = sand.u32 (!%p5340_p13), 1, %s4612_s10   ;;  %p5341_p8 = scmp.ne.s32.totalorder (!%p5340_p13), %s5329_s15, 0 }
  0x5b   : > { %339 = sbr.rel (%p5340_p13) target bundleno = 2089 (0x829), region = 56  ;;  %s3878_s4 = sshll.u32 (!%p5340_p13), %s4809_s3, 3 }
  0x5c   : > { %s342_s5 = scalar_lea.sflag (!%p5340_p13), [#allocation3], %s4809_s3  ;;  %s4815_s29 = scalar_lea.vmem (!%p5340_p13), [#allocation2], %s3878_s4 }
  0x60   : > { %4591 = dma.done.wait (%p5341_p8), %s342_s5, 128  }
  0x61   : > { %4593 = vsyncadd (%p5341_p8), %s342_s5, 4294967168  ;;  %p5342_p10 = scmp.eq.s32.totalorder %s4704_s13, 0 }
  0x63   : > { %4595 = dma.done.wait (%p5342_p10), [#allocation6], 1024   ;;  %p5343_p11 = pmov %p5342_p10 }
  0x64   : > { %p5344_p1 = pmov %p5342_p10 }
  0x65   : > { %4597 = vsyncadd (%p5343_p11), [#allocation6], 4294966272 }
  0x66   : > { %4599 = dma.done.wait (%p5344_p1), [#allocation9], 512   ;;  %p5345_p2 = pmov %p5344_p1 }
  0x67   : > { %vm393_vm0 = vcmask 261120   ;;  %v392_v0 = vld [vmem:[%s4815_s29] sm:$0xff]  ;;  %v425_v12 = vld [vmem:[#allocation5 + $0x8] sm:$0xff]  ;;  %v424_v16 = vld [vmem:[#allocation5] sm:$0xff]  ;;  %v4628_v24 = vmov 0.0   ;;  %vm4629_vm1 = vmmov 0  }
  0x68   : > { %4601 = vsyncadd (%p5345_p2), [#allocation9], 4294966784  ;;  %v394_v1 = vsel %vm393_vm0, %v392_v0, 0.0  ;;  %v427_v7 = vld [vmem:[#allocation5 + $0x18] sm:$0xff]  ;;  %v426_v9 = vld [vmem:[#allocation5 + $0x10] sm:$0xff]  ;;  %v4843_v15 = vand.u32 4294901760, %v425_v12  ;;  %4041 = vmatprep.subr.mxu1 %v4628_v24  ;;  %4030 = vmatprep.subr.mxu0 %v4628_v24 }
  0x69   : > { %395 = vadd.xlane.f32.xlu0 %v394_v1  ;;  %v4832_v8 = vand.u32 4294901760, %v427_v7  ;;  %v4837_v11 = vand.u32 4294901760, %v426_v9  ;;  %v4852_v20 = vand.u32 4294901760, %v424_v16  ;;  %4049 = vmatprep.mubr.msk.f32.mxu1 %vm4629_vm1, %v4628_v24  ;;  %v3883_v36 = vld [vmem:[%s5313_s1] ss:$0 sm:$0xff]  ;;  %v926_v42 = vld [vmem:[#allocation7 + $0x18] sm:$0xff] }
  0x6a   : > { %v4850_v19 = vsub.f32 %v425_v12, %v4843_v15  ;;  %4038 = vmatprep.mubr.msk.f32.mxu0 %vm4629_vm1, %v4628_v24  ;;  %v3884_v38 = vld [vmem:[%s5314_s2] ss:$0 sm:$0xff]  ;;  %v4899_v46 = vand.u32 4294901760, %v926_v42  ;;  %v924_v47 = vld [vmem:[#allocation7 + $0x8] sm:$0xff]  ;;  %v923_v50 = vld [vmem:[#allocation7] sm:$0xff]  ;;  %vm1915_vm2 = vcmask 130048  }
  0x6b   : > { %v4835_v10 = vsub.f32 %v427_v7, %v4832_v8  ;;  %v4841_v14 = vsub.f32 %v426_v9, %v4837_v11  ;;  %v4860_v25 = vsub.f32 %v424_v16, %v4852_v20  ;;  %4031 = vmatpush3.msra.mxu0 %v4832_v8  ;;  %v925_v44 = vld [vmem:[#allocation7 + $0x10] sm:$0xff]  ;;  %v4917_v53 = vand.u32 4294901760, %v924_v47  ;;  %v1422_v7 = vld [vmem:[#allocation8 + $0x18] sm:$0xff]  ;;  %v1419_v12 = vld [vmem:[#allocation8] sm:$0xff]  ;;  %s4630_s27 = smov 112   ;;  %s4631_s18 = smov 16  }
  0x6c   : > { %v558_v23 = vand.u32 4294901760, %v4850_v19  ;;  %4032 = vmatprep.subr.mxu0 %v4628_v24  ;;  %v4908_v49 = vand.u32 4294901760, %v925_v44  ;;  %v4915_v52 = vsub.f32 %v926_v42, %v4899_v46  ;;  %v4926_v56 = vand.u32 4294901760, %v923_v50  ;;  %v3885_v42 = vld [vmem:[%s5318_s6] ss:$0 sm:$0xff]  ;;  %s3889_s5 = sshll.u32 %s4704_s13, 7 }
  0x6d   : > { %v544_v13 = vand.u32 4294901760, %v4835_v10  ;;  %v551_v18 = vand.u32 4294901760, %v4841_v14  ;;  %v565_v28 = vand.u32 4294901760, %v4860_v25  ;;  %4033 = vmatpush3.msra.mxu0 %v4837_v11  ;;  %v4933_v58 = vsub.f32 %v924_v47, %v4917_v53  ;;  %s391_s15 = scalar_lea.vmem [#allocation10], %s3878_s4  ;;  %s3768_s28 = scalar_lea.hbm %s5321_s9, %s3889_s5 }
  0x6e   : > { %v559_v27 = vsub.f32 %v4850_v19, %v558_v23  ;;  %4034 = vmatprep.subr.mxu0 %v4628_v24  ;;  %v4924_v55 = vsub.f32 %v925_v44, %v4908_v49  ;;  %v1040_v57 = vand.u32 4294901760, %v4915_v52  ;;  %v4941_v60 = vsub.f32 %v923_v50, %v4926_v56  ;;  %s3770_s17 = sshll.u32 %s391_s15, 4  ;;  %s3757_s20 = scalar_lea.sflag [#allocation4], %s4809_s3  ;;  %s3771_s17 = int_to_ptr.vmem [resolvable:$true] %s3770_s17 }
  0x6f   : > { %v545_v17 = vsub.f32 %v4835_v10, %v544_v13  ;;  %v552_v22 = vsub.f32 %v4841_v14, %v551_v18  ;;  %v566_v30 = vsub.f32 %v4860_v25, %v565_v28  ;;  %4035 = vmatpush3.msra.mxu0 %v4843_v15  ;;  %v1054_v62 = vand.u32 4294901760, %v4933_v58  ;;  %s4548_s21 = scalar_lea.vmem %s3771_s17, 128  ;;  %p5346_p6 = scmp.ne.s32.totalorder %s5338_s14, 0 }
  0x70   : > { %v560_v29 = vand.u32 4294901760, %v559_v27  ;;  %4036 = vmatprep.subr.mxu0 %v4628_v24  ;;  %v1047_v59 = vand.u32 4294901760, %v4924_v55  ;;  %v1041_v61 = vsub.f32 %v4915_v52, %v1040_v57  ;;  %v5001_v9 = vand.u32 4294901760, %v1422_v7  ;;  %p4549_p4 = scmp.ne.s32.totalorder %s3771_s17, %s4548_s21  ;;  %s4632_s13 = smov [#allocation10]  }
  0x71   : > { %v546_v21 = vand.u32 4294901760, %v545_v17  ;;  %v553_v26 = vand.u32 4294901760, %v552_v22  ;;  %v567_v31 = vand.u32 4294901760, %v566_v30  ;;  %4037 = vmatpush3.msra.mxu0 %v4852_v20  ;;  %v5026_v16 = vand.u32 4294901760, %v1419_v12  ;;  %s4552_s4 = sshll.u32 %s4632_s13, 4  ;;  %s4553_s4 = int_to_ptr.vmem [resolvable:$false] %s4552_s4 }
  0x72   : > { %4052 = vmatprep.subr.mxu0 %v4628_v24  ;;  %v1048_v63 = vsub.f32 %v4924_v55, %v1047_v59  ;;  %v1042_v1 = vand.u32 4294901760, %v1041_v61  ;;  %vm2369_vm3 = vcmask 64512   ;;  %p4550_p12 = pnand %p4549_p4, %p5346_p6  ;;  %s4554_s26 = scalar_lea.vmem %s4553_s4, 256 }
  0x73   : > { %4042 = vmatpush3.msra.mxu1 %v546_v21  ;;  %p4555_p5 = scmp.lt.s32.totalorder %s3771_s17, %s4553_s4  ;;  %p4556_p3 = scmp.lt.s32.totalorder %s4554_s26, %s4548_s21 }
  0x74   : > { %4043 = vmatprep.subr.mxu1 %v4628_v24  ;;  %p4551_p0 = pneg %p4550_p12 }
  0x75   : > { %4044 = vmatpush3.msra.mxu1 %v553_v26  ;;  %p4557_p7 = por %p4556_p3, %p4555_p5 }
  0x76   : > { %4045 = vmatprep.subr.mxu1 %v4628_v24 }
  0x77   : > { %4046 = vmatpush3.msra.mxu1 %v560_v29  ;;  %p4558_p9 = pnand %p4557_p7, %p4551_p0 }
  0x78   : > { %4047 = vmatprep.subr.mxu1 %v4628_v24 }
  0x79   : > { %4048 = vmatpush3.msra.mxu1 %v567_v31 }
  0x7a   : > { %4063 = vmatprep.subr.mxu1 %v4628_v24 }
  0xf2   : > { %v396_v2 = vpop.xlane.xlu0 %395 }
  0xf3   : > { %v398_v3 = vmul.f32 0.03125, %v396_v2  ;;  %v1055_v2 = vsub.f32 %v4933_v58, %v1054_v62 }
  0xf5   : > { %v399_v4 = vsub.f32 %v392_v0, %v398_v3  ;;  %v1061_v0 = vand.u32 4294901760, %v4941_v60  ;;  %v1049_v3 = vand.u32 4294901760, %v1048_v63 }
  0xf7   : > { %v400_v5 = vmul.f32 %v399_v4, %v399_v4 }
  0xf9   : > { %v401_v6 = vsel %vm393_vm0, %v400_v5, 0.0  ;;  %v1056_v5 = vand.u32 4294901760, %v1055_v2 }
  0xfa   : > { %402 = vadd.xlane.f32.xlu0 %v401_v6 }
 0x183   : > { %v403_v32 = vpop.xlane.xlu0 %402 }
 0x184   : > { %v404_v33 = vmul.f32 0.03125, %v403_v32 }
 0x186   : > { %v405_v34 = vadd.f32 1e-05, %v404_v33 }
 0x188   : > { %4431 = vrsqrt.f32 %v405_v34 }
 0x195   : > { %v4432_v35 = vpop.eup %4431 }
 0x196   : > { %v407_v37 = vmul.f32 %v4432_v35, %v399_v4  ;;  %v1062_v4 = vsub.f32 %v4941_v60, %v1061_v0 }
 0x198   : > { %v415_v39 = vmul.f32 %v3883_v36, %v407_v37  ;;  %v1063_v6 = vand.u32 4294901760, %v1062_v4 }
 0x19a   : > { %v423_v40 = vadd.f32 %v3884_v38, %v415_v39 }
 0x19c   : > { %v436_v41 = vsel %vm393_vm0, %v423_v40, 0 }
 0x19d   : > { %v4893_v43 = vand.u32 4294901760, %v436_v41 }
 0x19f   : > { %4050 = vmatmul.mubr.f32.vlgmr.msra.gmra.mxu1 %v4893_v43  ;;  %v4897_v45 = vsub.f32 %v436_v41, %v4893_v43 }
 0x1a0   : > { %4064 = vmatpush3.msra.mxu1 %v4832_v8  ;;  %4071 = vmatprep.mubr.msk.f32.mxu1 %vm4629_vm1, %v4628_v24 }
 0x1a1   : > { %4065 = vmatprep.subr.mxu1 %v4628_v24  ;;  %v4906_v48 = vand.u32 4294901760, %v4897_v45 }
 0x1a2   : > { %4066 = vmatpush3.msra.mxu1 %v4837_v11 }
 0x1a3   : > { %4067 = vmatprep.subr.mxu1 %v4628_v24  ;;  %v510_v51 = vsub.f32 %v4897_v45, %v4906_v48 }
 0x1a4   : > { %4068 = vmatpush3.msra.mxu1 %v4843_v15 }
 0x1a5   : > { %4069 = vmatprep.subr.mxu1 %v4628_v24  ;;  %v4921_v54 = vand.u32 4294901760, %v510_v51 }
 0x1a6   : > { %4070 = vmatpush3.msra.mxu1 %v4852_v20 }
 0x1a7   : > { %4072 = vmatmul.mubr.f32.vlgmr.msra.gmra.mxu1 %v4906_v48  ;;  %4085 = vmatprep.subr.mxu1 %v4628_v24 }
 0x1a8   : > { %4039 = vmatmul.mubr.f32.vlgmr.msra.gmra.mxu0 %v4921_v54  ;;  %4086 = vmatpush3.msra.mxu1 %v4832_v8  ;;  %v1421_v8 = vld [vmem:[#allocation8 + $0x10] sm:$0xff] }
 0x1a9   : > { %4053 = vmatpush3.msra.mxu0 %v4835_v10  ;;  %4087 = vmatprep.subr.mxu1 %v4628_v24  ;;  %v1420_v10 = vld [vmem:[#allocation8 + $0x8] sm:$0xff] }
 0x1aa   : > { %4054 = vmatprep.subr.mxu0 %v4628_v24  ;;  %4088 = vmatpush3.msra.mxu1 %v4837_v11  ;;  %v5007_v11 = vand.u32 4294901760, %v1421_v8 }
 0x1ab   : > { %4055 = vmatpush3.msra.mxu0 %v4841_v14  ;;  %4089 = vmatprep.subr.mxu1 %v4628_v24  ;;  %v5016_v14 = vand.u32 4294901760, %v1420_v10 }
 0x1ac   : > { %4056 = vmatprep.subr.mxu0 %v4628_v24  ;;  %4090 = vmatpush3.msra.mxu1 %v4843_v15  ;;  %v5024_v15 = vsub.f32 %v1421_v8, %v5007_v11 }
 0x1ad   : > { %4057 = vmatpush3.msra.mxu0 %v4850_v19  ;;  %4091 = vmatprep.subr.mxu1 %v4628_v24 }
 0x1ae   : > { %4058 = vmatprep.subr.mxu0 %v4628_v24  ;;  %4060 = vmatprep.mubr.msk.f32.mxu0 %vm4629_vm1, %v4628_v24  ;;  %v1543_v19 = vand.u32 4294901760, %v5024_v15 }
 0x1af   : > { %4059 = vmatpush3.msra.mxu0 %v4860_v25  ;;  %4092 = vmatpush3.msra.mxu1 %v4852_v20  ;;  %v5043_v20 = vsub.f32 %v1419_v12, %v5026_v16 }
 0x1b0   : > { %4093 = vmatprep.mubr.msk.f32.mxu1 %vm4629_vm1, %v4628_v24  ;;  %4061 = vmatmul.mubr.f32.vlgmr.msra.gmra.mxu0 %v4897_v45 }
 0x1b1   : > { %4074 = vmatprep.subr.mxu0 %v4628_v24  ;;  %4094 = vmatmul.mubr.f32.vlgmr.msra.gmra.mxu1 %v4893_v43  ;;  %v1557_v25 = vand.u32 4294901760, %v5043_v20 }
 0x1b2   : > { %4107 = vmatprep.subr.mxu1 %v4628_v24  ;;  %4075 = vmatpush3.msra.mxu0 %v544_v13  ;;  %v5014_v13 = vsub.f32 %v1422_v7, %v5001_v9 }
 0x1b3   : > { %4108 = vmatpush3.msra.mxu1 %v1042_v1  ;;  %4076 = vmatprep.subr.mxu0 %v4628_v24  ;;  %v1558_v29 = vsub.f32 %v5043_v20, %v1557_v25 }
 0x1b4   : > { %4109 = vmatprep.subr.mxu1 %v4628_v24  ;;  %4077 = vmatpush3.msra.mxu0 %v551_v18  ;;  %v1536_v17 = vand.u32 4294901760, %v5014_v13  ;;  %v5035_v18 = vsub.f32 %v1420_v10, %v5016_v14 }
 0x1b5   : > { %4110 = vmatpush3.msra.mxu1 %v1049_v3  ;;  %4078 = vmatprep.subr.mxu0 %v4628_v24  ;;  %v1559_v31 = vand.u32 4294901760, %v1558_v29 }
 0x1b6   : > { %4111 = vmatprep.subr.mxu1 %v4628_v24  ;;  %4079 = vmatpush3.msra.mxu0 %v558_v23  ;;  %v1537_v21 = vsub.f32 %v5014_v13, %v1536_v17  ;;  %v1550_v22 = vand.u32 4294901760, %v5035_v18  ;;  %v1544_v23 = vsub.f32 %v5024_v15, %v1543_v19 }
 0x1b7   : > { %4112 = vmatpush3.msra.mxu1 %v1056_v5  ;;  %4080 = vmatprep.subr.mxu0 %v4628_v24 }
 0x1b8   : > { %4113 = vmatprep.subr.mxu1 %v4628_v24  ;;  %4081 = vmatpush3.msra.mxu0 %v565_v28  ;;  %v1538_v26 = vand.u32 4294901760, %v1537_v21  ;;  %v1551_v27 = vsub.f32 %v5035_v18, %v1550_v22  ;;  %v1545_v28 = vand.u32 4294901760, %v1544_v23 }
 0x1b9   : > { %4082 = vmatprep.mubr.msk.f32.mxu0 %vm4629_vm1, %v4628_v24  ;;  %4114 = vmatpush3.msra.mxu1 %v1063_v6 }
 0x1ba   : > { %4115 = vmatprep.mubr.msk.f32.mxu1 %vm4629_vm1, %v4628_v24  ;;  %4083 = vmatmul.mubr.f32.vlgmr.msra.gmra.mxu0 %v4893_v43  ;;  %v1552_v30 = vand.u32 4294901760, %v1551_v27 }
 0x1bb   : > { %4096 = vmatprep.subr.mxu0 %v4628_v24  ;;  %4116 = vmatmul.mubr.f32.vlgmr.msra.gmra.mxu1 %v4893_v43 }
 0x1bc   : > { %4129 = vmatprep.subr.mxu1 %v4628_v24  ;;  %4097 = vmatpush3.msra.mxu0 %v4899_v46 }
 0x1bd   : > { %4130 = vmatpush3.msra.mxu1 %v4899_v46  ;;  %4098 = vmatprep.subr.mxu0 %v4628_v24 }
 0x1be   : > { %4131 = vmatprep.subr.mxu1 %v4628_v24  ;;  %4099 = vmatpush3.msra.mxu0 %v4908_v49 }
 0x1bf   : > { %4132 = vmatpush3.msra.mxu1 %v4908_v49  ;;  %4100 = vmatprep.subr.mxu0 %v4628_v24 }
 0x1c0   : > { %4133 = vmatprep.subr.mxu1 %v4628_v24  ;;  %4101 = vmatpush3.msra.mxu0 %v4917_v53 }
 0x1c1   : > { %4134 = vmatpush3.msra.mxu1 %v4917_v53  ;;  %4102 = vmatprep.subr.mxu0 %v4628_v24 }
 0x1c2   : > { %4135 = vmatprep.subr.mxu1 %v4628_v24  ;;  %4103 = vmatpush3.msra.mxu0 %v4926_v56 }
 0x1c3   : > { %4104 = vmatprep.mubr.msk.f32.mxu0 %vm4629_vm1, %v4628_v24  ;;  %4136 = vmatpush3.msra.mxu1 %v4926_v56 }
 0x1c4   : > { %4137 = vmatprep.mubr.msk.f32.mxu1 %vm4629_vm1, %v4628_v24  ;;  %4105 = vmatmul.mubr.f32.vlgmr.msra.gmra.mxu0 %v4921_v54 }
 0x1c5   : > { %4118 = vmatprep.subr.mxu0 %v4628_v24  ;;  %4138 = vmatmul.mubr.f32.vlgmr.msra.gmra.mxu1 %v4906_v48 }
 0x1c6   : > { %4151 = vmatprep.subr.mxu1 %v4628_v24  ;;  %4119 = vmatpush3.msra.mxu0 %v4915_v52 }
 0x1c7   : > { %4152 = vmatpush3.msra.mxu1 %v4899_v46  ;;  %4120 = vmatprep.subr.mxu0 %v4628_v24 }
 0x1c8   : > { %4153 = vmatprep.subr.mxu1 %v4628_v24  ;;  %4121 = vmatpush3.msra.mxu0 %v4924_v55 }
 0x1c9   : > { %4154 = vmatpush3.msra.mxu1 %v4908_v49  ;;  %4122 = vmatprep.subr.mxu0 %v4628_v24 }
 0x1ca   : > { %4155 = vmatprep.subr.mxu1 %v4628_v24  ;;  %4123 = vmatpush3.msra.mxu0 %v4933_v58 }
 0x1cb   : > { %4156 = vmatpush3.msra.mxu1 %v4917_v53  ;;  %4124 = vmatprep.subr.mxu0 %v4628_v24 }
 0x1cc   : > { %4157 = vmatprep.subr.mxu1 %v4628_v24  ;;  %4125 = vmatpush3.msra.mxu0 %v4941_v60 }
 0x1cd   : > { %4126 = vmatprep.mubr.msk.f32.mxu0 %vm4629_vm1, %v4628_v24  ;;  %4158 = vmatpush3.msra.mxu1 %v4926_v56 }
 0x1ce   : > { %4159 = vmatprep.mubr.msk.f32.mxu1 %vm4629_vm1, %v4628_v24  ;;  %4127 = vmatmul.mubr.f32.vlgmr.msra.gmra.mxu0 %v4897_v45 }
 0x1cf   : > { %4140 = vmatprep.subr.mxu0 %v4628_v24  ;;  %4160 = vmatmul.mubr.f32.vlgmr.msra.gmra.mxu1 %v4893_v43 }
 0x1d0   : > { %4173 = vmatprep.subr.mxu1 %v4628_v24  ;;  %4141 = vmatpush3.msra.mxu0 %v1040_v57  ;;  %v3886_v57 = vld [vmem:[%s5319_s7] ss:$0 sm:$0xff] }
 0x1d1   : > { %4174 = vmatpush3.msra.mxu1 %v1538_v26  ;;  %4142 = vmatprep.subr.mxu0 %v4628_v24 }
 0x1d2   : > { %4175 = vmatprep.subr.mxu1 %v4628_v24  ;;  %4143 = vmatpush3.msra.mxu0 %v1047_v59 }
 0x1d3   : > { %4176 = vmatpush3.msra.mxu1 %v1545_v28  ;;  %4144 = vmatprep.subr.mxu0 %v4628_v24 }
 0x1d4   : > { %4177 = vmatprep.subr.mxu1 %v4628_v24  ;;  %4145 = vmatpush3.msra.mxu0 %v1054_v62 }
 0x1d5   : > { %4178 = vmatpush3.msra.mxu1 %v1552_v30  ;;  %4146 = vmatprep.subr.mxu0 %v4628_v24 }
 0x1d6   : > { %4179 = vmatprep.subr.mxu1 %v4628_v24  ;;  %4147 = vmatpush3.msra.mxu0 %v1061_v0 }
 0x1d7   : > { %4148 = vmatprep.mubr.msk.f32.mxu0 %vm4629_vm1, %v4628_v24  ;;  %4180 = vmatpush3.msra.mxu1 %v1559_v31 }
 0x1d8   : > { %4181 = vmatprep.mubr.msk.f32.mxu1 %vm4629_vm1, %v4628_v24  ;;  %4149 = vmatmul.mubr.f32.vlgmr.msra.gmra.mxu0 %v4893_v43 }
 0x1d9   : > { %4162 = vmatprep.subr.mxu0 %v4628_v24  ;;  %4182 = vmatmul.mubr.f32.vlgmr.msra.gmra.mxu1 %v4893_v43 }
 0x1da   : > { %4195 = vmatprep.subr.mxu1 %v4628_v24  ;;  %4163 = vmatpush3.msra.mxu0 %v5001_v9 }
 0x1db   : > { %4196 = vmatpush3.msra.mxu1 %v5001_v9  ;;  %4164 = vmatprep.subr.mxu0 %v4628_v24 }
 0x1dc   : > { %4197 = vmatprep.subr.mxu1 %v4628_v24  ;;  %4165 = vmatpush3.msra.mxu0 %v5007_v11 }
 0x1dd   : > { %4198 = vmatpush3.msra.mxu1 %v5007_v11  ;;  %4166 = vmatprep.subr.mxu0 %v4628_v24 }
 0x1de   : > { %4199 = vmatprep.subr.mxu1 %v4628_v24  ;;  %4167 = vmatpush3.msra.mxu0 %v5016_v14 }
 0x1df   : > { %4200 = vmatpush3.msra.mxu1 %v5016_v14  ;;  %4168 = vmatprep.subr.mxu0 %v4628_v24 }
 0x1e0   : > { %4201 = vmatprep.subr.mxu1 %v4628_v24  ;;  %4169 = vmatpush3.msra.mxu0 %v5026_v16 }
 0x1e1   : > { %4170 = vmatprep.mubr.msk.f32.mxu0 %vm4629_vm1, %v4628_v24  ;;  %4202 = vmatpush3.msra.mxu1 %v5026_v16 }
 0x1e2   : > { %4203 = vmatprep.mubr.msk.f32.mxu1 %vm4629_vm1, %v4628_v24  ;;  %4171 = vmatmul.mubr.f32.vlgmr.msra.gmra.mxu0 %v4921_v54 }
 0x1e3   : > { %4184 = vmatprep.subr.mxu0 %v4628_v24  ;;  %4204 = vmatmul.mubr.f32.vlgmr.msra.gmra.mxu1 %v4906_v48 }
 0x1e4   : > { %4217 = vmatprep.subr.mxu1 %v4628_v24  ;;  %4185 = vmatpush3.msra.mxu0 %v5014_v13 }
 0x1e5   : > { %4218 = vmatpush3.msra.mxu1 %v5001_v9  ;;  %4186 = vmatprep.subr.mxu0 %v4628_v24 }
 0x1e6   : > { %4219 = vmatprep.subr.mxu1 %v4628_v24  ;;  %4187 = vmatpush3.msra.mxu0 %v5024_v15 }
 0x1e7   : > { %4220 = vmatpush3.msra.mxu1 %v5007_v11  ;;  %4188 = vmatprep.subr.mxu0 %v4628_v24 }
 0x1e8   : > { %4221 = vmatprep.subr.mxu1 %v4628_v24  ;;  %4189 = vmatpush3.msra.mxu0 %v5035_v18 }
 0x1e9   : > { %4222 = vmatpush3.msra.mxu1 %v5016_v14  ;;  %4190 = vmatprep.subr.mxu0 %v4628_v24 }
 0x1ea   : > { %4223 = vmatprep.subr.mxu1 %v4628_v24  ;;  %4191 = vmatpush3.msra.mxu0 %v5043_v20 }
 0x1eb   : > { %4192 = vmatprep.mubr.msk.f32.mxu0 %vm4629_vm1, %v4628_v24  ;;  %4224 = vmatpush3.msra.mxu1 %v5026_v16 }
 0x1ec   : > { %4225 = vmatprep.mubr.msk.f32.mxu1 %vm4629_vm1, %v4628_v24  ;;  %4193 = vmatmul.mubr.f32.vlgmr.msra.gmra.mxu0 %v4897_v45 }
 0x1ed   : > { %4206 = vmatprep.subr.mxu0 %v4628_v24  ;;  %4226 = vmatmul.mubr.f32.vlgmr.msra.gmra.mxu1 %v4893_v43 }
 0x1ee   : > { %4207 = vmatpush3.msra.mxu0 %v1536_v17  ;;  %4214 = vmatprep.mubr.msk.f32.mxu0 %vm4629_vm1, %v4628_v24 }
 0x1ef   : > { %4208 = vmatprep.subr.mxu0 %v4628_v24  ;;  %4233 = vmatprep.subr.mxu1 %v4628_v24 }
 0x1f0   : > { %4209 = vmatpush3.msra.mxu0 %v1543_v19  ;;  %4235 = vmatprep.mubr.msk.f32.mxu1 %vm4629_vm1, %v4628_v24 }
 0x1f1   : > { %4210 = vmatprep.subr.mxu0 %v4628_v24 }
 0x1f2   : > { %4211 = vmatpush3.msra.mxu0 %v1550_v22 }
 0x1f3   : > { %4212 = vmatprep.subr.mxu0 %v4628_v24 }
 0x1f4   : > { %4213 = vmatpush3.msra.mxu0 %v1557_v25  ;;  %v3887_v25 = vld [vmem:[%s5320_s8] ss:$0 sm:$0xff] }
 0x1f5   : > { %4215 = vmatmul.mubr.f32.vlgmr.msra.gmra.mxu0 %v4893_v43  ;;  %4228 = vmatprep.subr.mxu0 %v4628_v24 }
 0x1f6   : > { %4230 = vmatprep.mubr.msk.f32.mxu0 %vm4629_vm1, %v4628_v24 }
 0x25f   : > { %v604_v32 = vpop.f32.mrf.mxu1 }
 0x261   : > { %v4051_v33 = vpop.f32.mrf.mxu1 }
 0x267   : > { %v761_v34 = vpop.f32.mrf.mxu1 }
 0x268   : > { %v513_v35 = vpop.f32.mrf.mxu0 }
 0x269   : > { %v4073_v36 = vpop.f32.mrf.mxu1  ;;  %v514_v43 = vadd.f32 %v3885_v42, %v513_v35 }
 0x26a   : > { %v4040_v37 = vpop.f32.mrf.mxu0 }
 0x26b   : > { %v605_v48 = vadd.f32 %v604_v32, %v514_v43 }
 0x270   : > { %v684_v38 = vpop.f32.mrf.mxu0 }
 0x271   : > { %v919_v39 = vpop.f32.mrf.mxu1  ;;  %v685_v49 = vadd.f32 %v684_v38, %v605_v48 }
 0x272   : > { %v4062_v40 = vpop.f32.mrf.mxu0 }
 0x273   : > { %v4095_v41 = vpop.f32.mrf.mxu1  ;;  %v762_v50 = vadd.f32 %v761_v34, %v685_v49 }
 0x27a   : > { %v844_v44 = vpop.f32.mrf.mxu0 }
 0x27b   : > { %v1100_v45 = vpop.f32.mrf.mxu1  ;;  %v845_v53 = vadd.f32 %v844_v44, %v762_v50 }
 0x27c   : > { %v4084_v46 = vpop.f32.mrf.mxu0 }
 0x27d   : > { %v4117_v47 = vpop.f32.mrf.mxu1  ;;  %v5166_v56 = vadd.f32 %v919_v39, %v845_v53 }
 0x27f   : > { %v1917_v59 = vsel %vm1915_vm2, %v5166_v56, 0 }
 0x280   : > { %v1988_v63 = vand.u32 4294901760, %v1917_v59 }
 0x282   : > { %v1989_v3 = vsub.f32 %v1917_v59, %v1988_v63 }
 0x284   : > { %v1009_v51 = vpop.f32.mrf.mxu0  ;;  %v1990_v8 = vand.u32 4294901760, %v1989_v3 }
 0x285   : > { %v1257_v52 = vpop.f32.mrf.mxu1  ;;  %v1010_v58 = vadd.f32 %v3886_v57, %v1009_v51 }
 0x286   : > { %v4106_v54 = vpop.f32.mrf.mxu0  ;;  %v1991_v13 = vsub.f32 %v1989_v3, %v1990_v8 }
 0x287   : > { %v4139_v55 = vpop.f32.mrf.mxu1  ;;  %v1101_v0 = vadd.f32 %v1100_v45, %v1010_v58 }
 0x288   : > { %v1992_v16 = vand.u32 4294901760, %v1991_v13 }
 0x28e   : > { %v1180_v60 = vpop.f32.mrf.mxu0 }
 0x28f   : > { %v1415_v61 = vpop.f32.mrf.mxu1  ;;  %v1181_v2 = vadd.f32 %v1180_v60, %v1101_v0 }
 0x290   : > { %v4128_v62 = vpop.f32.mrf.mxu0 }
 0x291   : > { %v4161_v1 = vpop.f32.mrf.mxu1  ;;  %v1258_v4 = vadd.f32 %v1257_v52, %v1181_v2 }
 0x298   : > { %v1340_v5 = vpop.f32.mrf.mxu0 }
 0x299   : > { %v1341_v6 = vadd.f32 %v1340_v5, %v1258_v4  ;;  %v1596_v7 = vpop.f32.mrf.mxu1 }
 0x29a   : > { %v4150_v9 = vpop.f32.mrf.mxu0 }
 0x29b   : > { %v1416_v10 = vadd.f32 %v1415_v61, %v1341_v6  ;;  %v4183_v11 = vpop.f32.mrf.mxu1 }
 0x29d   : > { %v1920_v12 = vsel %vm1915_vm2, %v1416_v10, 0  ;;  %2832 = vrot.lane.b32.xlu0 %v1416_v10, %s4630_s27 }
 0x29e   : > { %v1953_v14 = vand.u32 4294901760, %v1920_v12 }
 0x2a0   : > { %v2030_v15 = vsub.f32 %v1920_v12, %v1953_v14  ;;  %4229 = vmatpush3.xpose.msra.mxu0 %v1953_v14 }
 0x2a1   : > { %4238 = vmatprep.subr.mxu0 %v4628_v24 }
 0x2a2   : > { %v1505_v17 = vpop.f32.mrf.mxu0  ;;  %v2031_v18 = vand.u32 4294901760, %v2030_v15 }
 0x2a3   : > { %v1753_v19 = vpop.f32.mrf.mxu1  ;;  %4231 = vmatmul.mubr.f32.vlgmr.msra.gmra.mxu0 %v1992_v16  ;;  %v1506_v26 = vadd.f32 %v3887_v25, %v1505_v17 }
 0x2a4   : > { %v4172_v20 = vpop.f32.mrf.mxu0  ;;  %4239 = vmatpush3.xpose.msra.mxu0 %v2030_v15  ;;  %4240 = vmatprep.mubr.msk.f32.mxu0 %vm4629_vm1, %v4628_v24  ;;  %v2032_v21 = vsub.f32 %v2030_v15, %v2031_v18 }
 0x2a5   : > { %v4205_v22 = vpop.f32.mrf.mxu1  ;;  %4248 = vmatprep.subr.mxu0 %v4628_v24  ;;  %v1597_v29 = vadd.f32 %v1596_v7, %v1506_v26 }
 0x2a6   : > { %v2033_v23 = vand.u32 4294901760, %v2032_v21 }
 0x2a7   : > { %4241 = vmatmul.mubr.f32.vlgmr.msra.gmra.mxu0 %v1989_v3 }
 0x2a8   : > { %4234 = vmatpush3.xpose.msra.mxu1 %v2033_v23  ;;  %4249 = vmatpush3.xpose.msra.mxu0 %v2031_v18 }
 0x2a9   : > { %4250 = vmatprep.mubr.msk.f32.mxu0 %vm4629_vm1, %v4628_v24  ;;  %4243 = vmatprep.subr.mxu1 %v4628_v24 }
 0x2aa   : > { %4258 = vmatprep.subr.mxu0 %v4628_v24 }
 0x2ab   : > { %4236 = vmatmul.mubr.f32.vlgmr.msra.gmra.mxu1 %v1988_v63  ;;  %4251 = vmatmul.mubr.f32.vlgmr.msra.gmra.mxu0 %v1988_v63 }
 0x2ac   : > { %v1676_v27 = vpop.f32.mrf.mxu0  ;;  %4244 = vmatpush3.xpose.msra.mxu1 %v1953_v14  ;;  %4245 = vmatprep.mubr.msk.f32.mxu1 %vm4629_vm1, %v4628_v24 }
 0x2ad   : > { %v1911_v28 = vpop.f32.mrf.mxu1  ;;  %4253 = vmatprep.subr.mxu1 %v4628_v24  ;;  %4260 = vmatprep.mubr.msk.f32.mxu0 %vm4629_vm1, %v4628_v24  ;;  %v1677_v32 = vadd.f32 %v1676_v27, %v1597_v29 }
 0x2ae   : > { %v4194_v30 = vpop.f32.mrf.mxu0 }
 0x2af   : > { %v4227_v31 = vpop.f32.mrf.mxu1  ;;  %4246 = vmatmul.mubr.f32.vlgmr.msra.gmra.mxu1 %v1990_v8  ;;  %v1754_v33 = vadd.f32 %v1753_v19, %v1677_v32 }
 0x2b0   : > { %4254 = vmatpush3.xpose.msra.mxu1 %v1953_v14  ;;  %4255 = vmatprep.mubr.msk.f32.mxu1 %vm4629_vm1, %v4628_v24 }
 0x2b1   : > { %4263 = vmatprep.subr.mxu1 %v4628_v24 }
 0x2b3   : > { %4256 = vmatmul.mubr.f32.vlgmr.msra.gmra.mxu1 %v1988_v63 }
 0x2b4   : > { %4265 = vmatprep.mubr.msk.f32.mxu1 %vm4629_vm1, %v4628_v24 }
 0x2b5   : > { %v1836_v34 = vpop.f32.mrf.mxu0 }
 0x2b6   : > { %v1837_v35 = vadd.f32 %v1836_v34, %v1754_v33 }
 0x2b7   : > { %v4216_v36 = vpop.f32.mrf.mxu0 }
 0x2b8   : > { %v5196_v37 = vadd.f32 %v1911_v28, %v1837_v35 }
 0x2ba   : > { %v2415_v38 = vand.u32 4294901760, %v5196_v37 }
 0x2bc   : > { %v5200_v39 = vsub.f32 %v5196_v37, %v2415_v38  ;;  %4259 = vmatpush3.msra.mxu0 %v2415_v38 }
 0x2bd   : > { %4268 = vmatprep.subr.mxu0 %v4628_v24 }
 0x2be   : > { %v2493_v40 = vand.u32 4294901760, %v5200_v39 }
 0x2c0   : > { %v2494_v41 = vsub.f32 %v5200_v39, %v2493_v40 }
 0x2c2   : > { %v2495_v42 = vand.u32 4294901760, %v2494_v41 }
 0x2c4   : > { %4264 = vmatpush3.msra.mxu1 %v2495_v42 }
 0x2c5   : > { %4273 = vmatprep.subr.mxu1 %v4628_v24 }
 0x30f   : > { %v2833_v5 = vpop.permute.xlu0 %2832 }
 0x310   : > { %v2836_v6 = vsel %vm1915_vm2, %v2833_v5, 0 }
 0x311   : > { %v2869_v7 = vand.u32 4294901760, %v2836_v6 }
 0x313   : > { %v2946_v9 = vsub.f32 %v2836_v6, %v2869_v7 }
 0x315   : > { %v2947_v14 = vand.u32 4294901760, %v2946_v9 }
 0x317   : > { %v2948_v18 = vsub.f32 %v2946_v9, %v2947_v14 }
 0x319   : > { %v2949_v22 = vand.u32 4294901760, %v2948_v18 }
 0x363   : > { %v1994_v43 = vpop.f32.mrf.mxu0 }
 0x365   : > { %v4232_v44 = vpop.f32.mrf.mxu0 }
 0x367   : > { %v2144_v45 = vpop.f32.mrf.mxu0 }
 0x369   : > { %v4242_v46 = vpop.f32.mrf.mxu0 }
 0x36b   : > { %v2070_v47 = vpop.f32.mrf.mxu1  ;;  %v2292_v48 = vpop.f32.mrf.mxu0 }
 0x36c   : > { %v2071_v49 = vadd.f32 %v2070_v47, %v1994_v43 }
 0x36d   : > { %v4237_v50 = vpop.f32.mrf.mxu1  ;;  %v4252_v51 = vpop.f32.mrf.mxu0 }
 0x36e   : > { %v2145_v52 = vadd.f32 %v2144_v45, %v2071_v49 }
 0x36f   : > { %v2218_v53 = vpop.f32.mrf.mxu1 }
 0x370   : > { %v2219_v54 = vadd.f32 %v2218_v53, %v2145_v52 }
 0x371   : > { %v4247_v55 = vpop.f32.mrf.mxu1 }
 0x372   : > { %v2293_v57 = vadd.f32 %v2292_v48, %v2219_v54 }
 0x373   : > { %v2364_v58 = vpop.f32.mrf.mxu1 }
 0x374   : > { %v2365_v59 = vadd.f32 %v2364_v58, %v2293_v57 }
 0x375   : > { %v4257_v60 = vpop.f32.mrf.mxu1 }
 0x376   : > { %v2368_v61 = vmul.f32 0.25, %v2365_v59 }
 0x378   : > { %v2370_v62 = vsel %vm2369_vm3, %v2368_v61, -inf }
 0x379   : > { %2371 = vmax.xlane.f32.xlu1 %v2370_v62 }
 0x402   : > { %v2372_v63 = vpop.xlane.xlu1 %2371 }
 0x403   : > { %v2373_v0 = vsub.f32 %v2368_v61, %v2372_v63 }
 0x405   : > { %v2374_v1 = vmul.f32 1.442695, %v2373_v0 }
 0x407   : > { %4433 = vpow2.f32 %v2374_v1 }
 0x414   : > { %v4434_v2 = vpop.eup %4433 }
 0x415   : > { %v2376_v3 = vsel %vm2369_vm3, %v4434_v2, 0.0 }
 0x416   : > { %2377 = vadd.xlane.f32.xlu1 %v2376_v3 }
 0x427   : > { %2830 = vrot.lane.b32.xlu1 %v5166_v56, %s4630_s27 }
 0x49f   : > { %v2378_v4 = vpop.xlane.xlu1 %2377 }
 0x4a0   : > { %4435 = vrcp.f32 %v2378_v4 }
 0x4a3   : > { %v2831_v11 = vpop.permute.xlu1 %2830 }
 0x4a4   : > { %v2834_v15 = vsel %vm1915_vm2, %v2831_v11, 0 }
 0x4a5   : > { %v2904_v56 = vand.u32 4294901760, %v2834_v15 }
 0x4a7   : > { %v2905_v20 = vsub.f32 %v2834_v15, %v2904_v56 }
 0x4a9   : > { %v2906_v23 = vand.u32 4294901760, %v2905_v20 }
 0x4ab   : > { %v2907_v25 = vsub.f32 %v2905_v20, %v2906_v23 }
 0x4ad   : > { %v4436_v8 = vpop.eup %4435  ;;  %v2908_v26 = vand.u32 4294901760, %v2907_v25 }
 0x4ae   : > { %v2380_v10 = vmul.f32 %v4436_v8, %v4434_v2 }
 0x4b0   : > { %v2382_v12 = vsel %vm2369_vm3, %v2380_v10, 0 }
 0x4b1   : > { %v2450_v13 = vand.u32 4294901760, %v2382_v12 }
 0x4b3   : > { %v2451_v16 = vsub.f32 %v2382_v12, %v2450_v13  ;;  %4266 = vmatmul.mubr.f32.vlgmr.msra.gmra.mxu1 %v2450_v13 }
 0x4b4   : > { %4274 = vmatpush3.msra.mxu1 %v2415_v38  ;;  %4275 = vmatprep.mubr.msk.f32.mxu1 %vm4629_vm1, %v4628_v24 }
 0x4b5   : > { %4283 = vmatprep.subr.mxu1 %v4628_v24  ;;  %v2452_v17 = vand.u32 4294901760, %v2451_v16 }
 0x4b7   : > { %4276 = vmatmul.mubr.f32.vlgmr.msra.gmra.mxu1 %v2452_v17  ;;  %v2453_v19 = vsub.f32 %v2451_v16, %v2452_v17 }
 0x4b8   : > { %4284 = vmatpush3.msra.mxu1 %v2415_v38  ;;  %4285 = vmatprep.mubr.msk.f32.mxu1 %vm4629_vm1, %v4628_v24 }
 0x4b9   : > { %4293 = vmatprep.subr.mxu1 %v4628_v24  ;;  %v2454_v21 = vand.u32 4294901760, %v2453_v19 }
 0x4bb   : > { %4261 = vmatmul.mubr.f32.vlgmr.msra.gmra.mxu0 %v2454_v21  ;;  %4286 = vmatmul.mubr.f32.vlgmr.msra.gmra.mxu1 %v2450_v13 }
 0x4bc   : > { %4269 = vmatpush3.msra.mxu0 %v5200_v39  ;;  %4294 = vmatpush3.xpose.msra.mxu1 %v2949_v22 }
 0x4bd   : > { %4270 = vmatprep.mubr.msk.f32.mxu0 %vm4629_vm1, %v4628_v24  ;;  %4278 = vmatprep.subr.mxu0 %v4628_v24 }
 0x4be   : > { %4295 = vmatprep.mubr.msk.f32.mxu1 %vm4629_vm1, %v4628_v24  ;;  %4303 = vmatprep.subr.mxu1 %v4628_v24 }
 0x4bf   : > { %4271 = vmatmul.mubr.f32.vlgmr.msra.gmra.mxu0 %v2451_v16  ;;  %4296 = vmatmul.mubr.f32.vlgmr.msra.gmra.mxu1 %v2904_v56 }
 0x4c0   : > { %4279 = vmatpush3.msra.mxu0 %v2493_v40  ;;  %4304 = vmatpush3.xpose.msra.mxu1 %v2869_v7 }
 0x4c1   : > { %4280 = vmatprep.mubr.msk.f32.mxu0 %vm4629_vm1, %v4628_v24  ;;  %4288 = vmatprep.subr.mxu0 %v4628_v24 }
 0x4c2   : > { %4305 = vmatprep.mubr.msk.f32.mxu1 %vm4629_vm1, %v4628_v24  ;;  %4313 = vmatprep.subr.mxu1 %v4628_v24 }
 0x4c3   : > { %4281 = vmatmul.mubr.f32.vlgmr.msra.gmra.mxu0 %v2450_v13  ;;  %4306 = vmatmul.mubr.f32.vlgmr.msra.gmra.mxu1 %v2906_v23 }
 0x4c4   : > { %4289 = vmatpush3.xpose.msra.mxu0 %v2869_v7  ;;  %4314 = vmatpush3.xpose.msra.mxu1 %v2869_v7 }
 0x4c5   : > { %4290 = vmatprep.mubr.msk.f32.mxu0 %vm4629_vm1, %v4628_v24  ;;  %4298 = vmatprep.subr.mxu0 %v4628_v24 }
 0x4c6   : > { %4315 = vmatprep.mubr.msk.f32.mxu1 %vm4629_vm1, %v4628_v24  ;;  %4323 = vmatprep.subr.mxu1 %v4628_v24 }
 0x4c7   : > { %4291 = vmatmul.mubr.f32.vlgmr.msra.gmra.mxu0 %v2908_v26  ;;  %4316 = vmatmul.mubr.f32.vlgmr.msra.gmra.mxu1 %v2904_v56 }
 0x4c8   : > { %4299 = vmatpush3.xpose.msra.mxu0 %v2946_v9  ;;  %4300 = vmatprep.mubr.msk.f32.mxu0 %vm4629_vm1, %v4628_v24 }
 0x4c9   : > { %4308 = vmatprep.subr.mxu0 %v4628_v24  ;;  %4325 = vmatprep.mubr.msk.f32.mxu1 %vm4629_vm1, %v4628_v24 }
 0x4cb   : > { %4301 = vmatmul.mubr.f32.vlgmr.msra.gmra.mxu0 %v2905_v20 }
 0x4cc   : > { %4309 = vmatpush3.xpose.msra.mxu0 %v2947_v14  ;;  %4310 = vmatprep.mubr.msk.f32.mxu0 %vm4629_vm1, %v4628_v24 }
 0x4cd   : > { %4318 = vmatprep.subr.mxu0 %v4628_v24 }
 0x4cf   : > { %4311 = vmatmul.mubr.f32.vlgmr.msra.gmra.mxu0 %v2904_v56 }
 0x4d0   : > { %4320 = vmatprep.mubr.msk.f32.mxu0 %vm4629_vm1, %v4628_v24 }
 0x573   : > { %v2532_v27 = vpop.f32.mrf.mxu1 }
 0x575   : > { %v4267_v28 = vpop.f32.mrf.mxu1 }
 0x577   : > { %v2680_v29 = vpop.f32.mrf.mxu1 }
 0x579   : > { %v4277_v30 = vpop.f32.mrf.mxu1 }
 0x57b   : > { %v2456_v31 = vpop.f32.mrf.mxu0  ;;  %v2826_v32 = vpop.f32.mrf.mxu1 }
 0x57c   : > { %v2533_v33 = vadd.f32 %v2532_v27, %v2456_v31 }
 0x57d   : > { %v4262_v34 = vpop.f32.mrf.mxu0  ;;  %v4287_v35 = vpop.f32.mrf.mxu1 }
 0x57f   : > { %v2606_v36 = vpop.f32.mrf.mxu0  ;;  %v2986_v38 = vpop.f32.mrf.mxu1 }
 0x580   : > { %v2607_v39 = vadd.f32 %v2606_v36, %v2533_v33 }
 0x581   : > { %v4272_v40 = vpop.f32.mrf.mxu0  ;;  %v4297_v41 = vpop.f32.mrf.mxu1 }
 0x582   : > { %v2681_v42 = vadd.f32 %v2680_v29, %v2607_v39  ;;  %v4441_v39 = vld [vmem:[%s4815_s29] sm:$0xff] }
 0x583   : > { %v2754_v43 = vpop.f32.mrf.mxu0  ;;  %v3134_v44 = vpop.f32.mrf.mxu1 }
 0x584   : > { %v2755_v45 = vadd.f32 %v2754_v43, %v2681_v42 }
 0x585   : > { %v4282_v46 = vpop.f32.mrf.mxu0  ;;  %v4307_v47 = vpop.f32.mrf.mxu1 }
 0x586   : > { %v5252_v48 = vadd.f32 %v2826_v32, %v2755_v45 }
 0x587   : > { %v2910_v49 = vpop.f32.mrf.mxu0  ;;  %v3280_v50 = vpop.f32.mrf.mxu1 }
 0x588   : > { %v2987_v53 = vadd.f32 %v2986_v38, %v2910_v49 }
 0x589   : > { %v4292_v51 = vpop.f32.mrf.mxu0  ;;  %v4317_v52 = vpop.f32.mrf.mxu1 }
 0x58b   : > { %v3060_v54 = vpop.f32.mrf.mxu0 }
 0x58c   : > { %v3061_v55 = vadd.f32 %v3060_v54, %v2987_v53 }
 0x58d   : > { %v4302_v57 = vpop.f32.mrf.mxu0 }
 0x58e   : > { %v3135_v58 = vadd.f32 %v3134_v44, %v3061_v55 }
 0x58f   : > { %v3208_v59 = vpop.f32.mrf.mxu0 }
 0x590   : > { %v3209_v60 = vadd.f32 %v3208_v59, %v3135_v58 }
 0x591   : > { %v4312_v61 = vpop.f32.mrf.mxu0 }
 0x592   : > { %v3281_v62 = vadd.f32 %v3280_v50, %v3209_v60 }
 0x594   : > { %v3284_v63 = vmul.f32 0.25, %v3281_v62 }
 0x596   : > { %v3285_v0 = vsel %vm2369_vm3, %v3284_v63, -inf }
 0x597   : > { %3286 = vmax.xlane.f32.xlu1 %v3285_v0 }
 0x620   : > { %v3287_v1 = vpop.xlane.xlu1 %3286 }
 0x621   : > { %v3288_v2 = vsub.f32 %v3284_v63, %v3287_v1 }
 0x623   : > { %v3289_v3 = vmul.f32 1.442695, %v3288_v2 }
 0x625   : > { %4437 = vpow2.f32 %v3289_v3 }
 0x632   : > { %v4438_v4 = vpop.eup %4437 }
 0x633   : > { %v3291_v5 = vsel %vm2369_vm3, %v4438_v4, 0.0 }
 0x634   : > { %3292 = vadd.xlane.f32.xlu0 %v3291_v5 }
 0x64a   : > { %3297 = vrot.lane.b32.xlu0 %v5196_v37, %s4630_s27 }
 0x6bd   : > { %v3293_v6 = vpop.xlane.xlu0 %3292 }
 0x6be   : > { %4439 = vrcp.f32 %v3293_v6 }
 0x6c1   : > { %v3298_v7 = vpop.permute.xlu0 %3297 }
 0x6c2   : > { %v3334_v8 = vand.u32 4294901760, %v3298_v7 }
 0x6c4   : > { %v3411_v9 = vsub.f32 %v3298_v7, %v3334_v8  ;;  %4319 = vmatpush3.msra.mxu0 %v3334_v8 }
 0x6c5   : > { %4328 = vmatprep.subr.mxu0 %v4628_v24 }
 0x6c6   : > { %v3412_v10 = vand.u32 4294901760, %v3411_v9 }
 0x6c8   : > { %v3413_v11 = vsub.f32 %v3411_v9, %v3412_v10 }
 0x6ca   : > { %v3414_v12 = vand.u32 4294901760, %v3413_v11 }
 0x6cb   : > { %v4440_v13 = vpop.eup %4439 }
 0x6cc   : > { %4324 = vmatpush3.msra.mxu1 %v3414_v12  ;;  %v3295_v14 = vmul.f32 %v4440_v13, %v4438_v4 }
 0x6cd   : > { %4333 = vmatprep.subr.mxu1 %v4628_v24 }
 0x6ce   : > { %v3301_v15 = vsel %vm2369_vm3, %v3295_v14, 0 }
 0x6cf   : > { %v3369_v16 = vand.u32 4294901760, %v3301_v15 }
 0x6d1   : > { %v3370_v37 = vsub.f32 %v3301_v15, %v3369_v16  ;;  %4326 = vmatmul.mubr.f32.vlgmr.msra.gmra.mxu1 %v3369_v16 }
 0x6d2   : > { %4334 = vmatpush3.msra.mxu1 %v3334_v8  ;;  %4335 = vmatprep.mubr.msk.f32.mxu1 %vm4629_vm1, %v4628_v24 }
 0x6d3   : > { %4343 = vmatprep.subr.mxu1 %v4628_v24  ;;  %v3371_v56 = vand.u32 4294901760, %v3370_v37 }
 0x6d5   : > { %4336 = vmatmul.mubr.f32.vlgmr.msra.gmra.mxu1 %v3371_v56  ;;  %v3372_v17 = vsub.f32 %v3370_v37, %v3371_v56 }
 0x6d6   : > { %4344 = vmatpush3.msra.mxu1 %v3334_v8  ;;  %4345 = vmatprep.mubr.msk.f32.mxu1 %vm4629_vm1, %v4628_v24 }
 0x6d7   : > { %v3373_v18 = vand.u32 4294901760, %v3372_v17 }
 0x6d9   : > { %4321 = vmatmul.mubr.f32.vlgmr.msra.gmra.mxu0 %v3373_v18  ;;  %4346 = vmatmul.mubr.f32.vlgmr.msra.gmra.mxu1 %v3369_v16 }
 0x6da   : > { %4329 = vmatpush3.msra.mxu0 %v3411_v9  ;;  %4330 = vmatprep.mubr.msk.f32.mxu0 %vm4629_vm1, %v4628_v24 }
 0x6db   : > { %4338 = vmatprep.subr.mxu0 %v4628_v24 }
 0x6dd   : > { %4331 = vmatmul.mubr.f32.vlgmr.msra.gmra.mxu0 %v3370_v37 }
 0x6de   : > { %4339 = vmatpush3.msra.mxu0 %v3412_v10  ;;  %4340 = vmatprep.mubr.msk.f32.mxu0 %vm4629_vm1, %v4628_v24 }
 0x6e1   : > { %4341 = vmatmul.mubr.f32.vlgmr.msra.gmra.mxu0 %v3369_v16 }
 0x791   : > { %v3451_v19 = vpop.f32.mrf.mxu1 }
 0x793   : > { %v4327_v20 = vpop.f32.mrf.mxu1 }
 0x795   : > { %v3599_v21 = vpop.f32.mrf.mxu1 }
 0x797   : > { %v4337_v22 = vpop.f32.mrf.mxu1 }
 0x799   : > { %v3375_v23 = vpop.f32.mrf.mxu0  ;;  %v3745_v25 = vpop.f32.mrf.mxu1 }
 0x79a   : > { %v3452_v28 = vadd.f32 %v3451_v19, %v3375_v23 }
 0x79b   : > { %v4322_v26 = vpop.f32.mrf.mxu0  ;;  %v4347_v27 = vpop.f32.mrf.mxu1 }
 0x79d   : > { %v3525_v29 = vpop.f32.mrf.mxu0 }
 0x79e   : > { %v3526_v30 = vadd.f32 %v3525_v29, %v3452_v28 }
 0x79f   : > { %v4332_v31 = vpop.f32.mrf.mxu0 }
 0x7a0   : > { %v3600_v32 = vadd.f32 %v3599_v21, %v3526_v30 }
 0x7a1   : > { %v3673_v33 = vpop.f32.mrf.mxu0 }
 0x7a2   : > { %v3674_v24 = vadd.f32 %v3673_v33, %v3600_v32 }
 0x7a3   : > { %v4342_v34 = vpop.f32.mrf.mxu0 }
 0x7a4   : > { %v3746_v35 = vadd.f32 %v3745_v25, %v3674_v24 }
 0x7a6   : > { %3750 = vrot.lane.b32.xlu1 %v3746_v35, %s4631_s18 }
 0x818   : > { %v3751_v36 = vpop.permute.xlu1 %3750 }
 0x819   : > { %v3753_v38 = vsel %vm1915_vm2, %v5252_v48, %v3751_v36 }
 0x81a   : > { %v3754_v40 = vadd.f32 %v4441_v39, %v3753_v38 }
 0x81c   : > { %3755 = vst.msk [vmem:[%s391_s15] sm:$0xff] %vm393_vm0, %v3754_v40 }
 0x81d   : > { %4561 = shalt.err (!%p4558_p9)
}
 0x81e   : > { %s4562_s29 = scalar_lea.hbm %s3768_s28, 128  ;;  %s4566_s24 = scalar_lea.hbm %s5321_s9, 256 }
 0x81f   : > { %p4563_p13 = scmp.ne.s32.totalorder %s3768_s28, %s4562_s29  ;;  %p4567_p11 = scmp.lt.s32.totalorder %s3768_s28, %s5321_s9 }
 0x820   : > { %p4568_p1 = scmp.lt.s32.totalorder %s4566_s24, %s4562_s29 }
 0x821   : > { %p4564_p8 = pnand %p4563_p13, %p5346_p6 }
 0x822   : > { %p4569_p2 = por %p4568_p1, %p4567_p11 }
 0x823   : > { %p4565_p10 = pneg %p4564_p8 }
 0x825   : > { %p4570_p4 = pnand %p4569_p2, %p4565_p10 }
 0x827   : > { %4573 = shalt.err (!%p4570_p4)
}
 0x828   : > { %4362 = dma.vmem_to_hbm [thread:$0]  (%p5346_p6), %s3771_s17, 128, %s3768_s28, %s3757_s20  }
 0x829 PF: > { %s3782_s5 = sand.u32 1, %s4608_s30   ;;  %p5347_p12 = scmp.ne.s32.totalorder %s5330_s16, 0 }
 0x82a   : > { %p5348_p0 = scmp.ge.s32.totalorder %s4620_s12, 2  ;;  %s3783_s15 = scalar_lea.sflag [#allocation4], %s3782_s5 }
 0x82c   : > { %p4379_p5 = pnand %p5348_p0, %p5347_p12 }
 0x82e   : > { %p4380_p3 = pneg %p4379_p5 }
 0x830   : > { %4603 = dma.done.wait (%p4380_p3), %s3783_s15, 128  }
 0x831   : > { %4605 = vsyncadd (%p4380_p3), %s3783_s15, 4294967168  ;;  %s5349_s19 = sld [smem:[#allocation15_spill]]  ;;  %p24_p7 = scmp.ge.s32.totalorder %s4763_s22, 4  }
 0x832   : > { %s5350_s30 = smov %s4612_s10  ;;  %s5351_s10 = smov %s4616_s11 }
 0x833   : > { %s5353_s12 = smov %s4763_s22  ;;  %26 = sbr.rel (!%p24_p7) target bundleno = 11 (0xb), region = 113 }
 0x837   : > { %s5352_s11 = smov %s5349_s19 }
 0x838   :  { %3788 = vsyncpa [#allocation3], 1 }
 0x839   :  { %3790 = vsyncpa [#allocation3 + $0x1], 1 }
 0x83a   :  { %3791 = vsyncpa [#allocation6], 1 }
 0x83b   :  { %3792 = vsyncpa [#allocation9], 1 }
 0x83c   :  { %3793 = vsyncpa [#allocation4], 1 }
 0x83d   :  { %3795 = vsyncpa [#allocation4 + $0x1], 1 }

</bundles_post_ra>
